<compile_context>
chip_gen: v6e
topology: v6e:2x2x1
jax: 0.10.0
libtpu: 0.0.40
codegen_flags: <defaults>
</compile_context>

<pallas_src>
import numpy as np

import jax
import jax.numpy as jnp
from jax.experimental import pallas as pl
from jax.experimental.pallas import tpu as pltpu


# ----------------------------- fused Pallas kernel --------------------------


def _inos_fused_kernel(xp1_ref, w1c_ref, b1c_ref, w2c_ref, b2c_ref,
                       wfc1_ref, bfc1_ref, wfc2_ref, bfc2_ref,
                       wh_ref, bh_ref,
                       o_ref, xp2_ref, feats_ref):
    """Entire forward pass (conv1+pool, conv2+pool, fc1, fc2, heads)."""
    f32, bf16 = jnp.float32, jnp.bfloat16
    B = xp1_ref.shape[0]

    def conv_relu_pool(x_ref, w_ref, b_ref, write_row):
        # x_ref: (B, H+2, W*Cin) row-padded input, row layout (w*Cin + c)
        # w_ref: (6, W*Cin, Wo*Cout) block weights, index = row_tap*2 + parity
        # b_ref: (1, Wo*Cout) bias tiled along the pooled-width axis
        H = x_ref.shape[1] - 2
        Ho = H // 2
        n_out = w_ref.shape[2]
        for b in range(B):
            acc0 = jnp.zeros((H, n_out), f32)   # output columns w = 2*wo
            acc1 = jnp.zeros((H, n_out), f32)   # output columns w = 2*wo + 1
            for di in range(3):                 # 3x3 row taps, in-kernel im2col
                xr = x_ref[b, di:di + H, :].astype(bf16)
                acc0 = acc0 + jnp.dot(xr, w_ref[di * 2 + 0],
                                      preferred_element_type=f32)
                acc1 = acc1 + jnp.dot(xr, w_ref[di * 2 + 1],
                                      preferred_element_type=f32)
            # fused bias + ReLU + width-direction 2x pool (parity max)
            y = jnp.maximum(jnp.maximum(acc0, acc1) + b_ref[...], 0.0)
            # height-direction 2x pool: max over row pairs
            for ho in range(Ho):
                write_row(b, ho,
                          jnp.maximum(y[2 * ho:2 * ho + 1, :],
                                      y[2 * ho + 1:2 * ho + 2, :]))

    # ---- conv1 + ReLU + 2x2 maxpool -> row-padded conv2 input (scratch) ----
    xp2_ref[...] = jnp.zeros(xp2_ref.shape, f32)     # zero incl. padding rows

    def _write_xp2(b, ho, row):
        xp2_ref[b, ho + 1:ho + 2, :] = row

    conv_relu_pool(xp1_ref, w1c_ref, b1c_ref, _write_xp2)

    # ---- conv2 + ReLU + 2x2 maxpool -> flattened features (scratch) --------
    def _write_feats(b, ho, row):
        feats_ref[ho, b:b + 1, :] = row

    conv_relu_pool(xp2_ref, w2c_ref, b2c_ref, _write_feats)

    # ---- fused MLP tail: fc1 -> ReLU -> fc2 -> ReLU -> [cls | inos] --------
    n_chunks = feats_ref.shape[0]
    ck = feats_ref.shape[2]
    h1 = jnp.zeros((B, wfc1_ref.shape[1]), f32)
    for i in range(n_chunks):                  # flatten folded into K-chunks
        h1 = h1 + jnp.dot(feats_ref[i].astype(bf16),
                          wfc1_ref[i * ck:(i + 1) * ck, :],
                          preferred_element_type=f32)
    h1 = jnp.maximum(h1 + bfc1_ref[...], 0.0)
    h2 = jnp.dot(h1.astype(bf16), wfc2_ref[...], preferred_element_type=f32)
    h2 = jnp.maximum(h2 + bfc2_ref[...], 0.0)
    out = jnp.dot(h2.astype(bf16), wh_ref[...], preferred_element_type=f32)
    o_ref[...] = (out + bh_ref[...]).astype(o_ref.dtype)


# --------------------------- parameter construction -------------------------


def _build_conv_pool_params(k_oihw, bias, width):
    """Block-structured (per row-tap, per column-parity) conv weights.

    Input row layout is (w*Cin + c) with rows zero-padded by 1 (columns are
    NOT padded; border taps are simply dropped from the weight, which is
    equivalent to zero padding).  Output row layout is (wo*Cout + o) for the
    2x2-pooled width wo = w // 2.
    """
    cout, cin, kh, kw = k_oihw.shape
    assert kh == 3 and kw == 3
    wo = width // 2
    k_np = np.asarray(k_oihw, np.float32)
    w_blk = np.zeros((6, width * cin, wo * cout), np.float32)
    for di in range(3):            # kernel row tap
        for p in range(2):         # output-column parity (fuses width pooling)
            for dj in range(3):    # kernel column tap
                for j in range(wo):
                    wi = 2 * j + p + dj - 1          # unpadded input column
                    if 0 <= wi < width:
                        w_blk[di * 2 + p,
                              wi * cin:(wi + 1) * cin,
                              j * cout:(j + 1) * cout] += k_np[:, :, di, dj].T
    b_tile = np.tile(np.asarray(bias, np.float32), wo).reshape(1, wo * cout)
    return jnp.asarray(w_blk, jnp.bfloat16), jnp.asarray(b_tile, jnp.float32)


def init_params(key, num_classes=10):
    """Returns (kernel_params, raw_params). Raw params are PyTorch-layout."""
    ks = jax.random.split(key, 12)

    def u(k, shape, fan_in):
        bound = 1.0 / np.sqrt(fan_in)
        return jax.random.uniform(k, shape, jnp.float32, -bound, bound)

    # miniature VGG-style backbone (PyTorch layouts)
    k1 = u(ks[0], (8, 3, 3, 3), 3 * 9)
    b1 = u(ks[1], (8,), 3 * 9)
    k2 = u(ks[2], (16, 8, 3, 3), 8 * 9)
    b2 = u(ks[3], (16,), 8 * 9)
    flat = 16 * 4 * 4                         # C*H*W after the two 2x2 pools
    fc1_w = u(ks[4], (flat, 64), flat)        # stored (in, out)
    fc1_b = u(ks[5], (64,), flat)
    fc2_w = u(ks[6], (64, 32), 64)
    fc2_b = u(ks[7], (32,), 64)
    cls_w = u(ks[8], (32, num_classes), 32)
    cls_b = u(ks[9], (num_classes,), 32)
    inos_w = u(ks[10], (32, 1), 32)
    inos_b = u(ks[11], (1,), 32)

    p = {}
    p["w1c"], p["b1c"] = _build_conv_pool_params(k1, b1, 16)
    p["w2c"], p["b2c"] = _build_conv_pool_params(k2, b2, 8)

    # fc1: PyTorch flattens NCHW (c, h, w); the kernel's feature layout is
    # (h, w, c) -> repack the weight rows once at init (zero runtime cost).
    hh, ww, cc = 4, 4, 16
    idx = np.arange(flat)
    h_i, rem = idx // (ww * cc), idx % (ww * cc)
    w_i, c_i = rem // cc, rem % cc
    perm = c_i * (hh * ww) + h_i * ww + w_i
    p["wfc1"] = jnp.asarray(np.asarray(fc1_w)[perm, :], jnp.bfloat16)
    p["bfc1"] = fc1_b.reshape(1, 64)
    p["wfc2"] = fc2_w.astype(jnp.bfloat16)
    p["bfc2"] = fc2_b.reshape(1, 32)
    # both heads packed into one matmul: [cls | inos]
    p["wh"] = jnp.concatenate([cls_w, inos_w], axis=1).astype(jnp.bfloat16)
    p["bh"] = jnp.concatenate([cls_b, inos_b]).reshape(1, num_classes + 1)

    raw = dict(k1=k1, b1=b1, k2=k2, b2=b2, fc1_w=fc1_w, fc1_b=fc1_b,
               fc2_w=fc2_w, fc2_b=fc2_b, cls_w=cls_w, cls_b=cls_b,
               inos_w=inos_w, inos_b=inos_b)
    return p, raw


# -------------------------------- forward pass ------------------------------


def inos_forward(params, x_nchw):
    """x: (B, 3, 16, 16) NCHW float32 -> (c_x, r_x)."""
    B, C, H, W = x_nchw.shape
    assert (C, H, W) == (3, 16, 16), "model is built for 3x16x16 inputs"
    nc1 = params["wh"].shape[1]                       # num_classes + 1

    # NCHW -> per-image rows of layout (w*C + c); zero-pad rows by 1 for the
    # 3x3 conv (column padding is folded into the conv block weights).
    x = jnp.transpose(x_nchw, (0, 2, 3, 1)).reshape(B, H, W * C)
    xp1 = jnp.pad(x, ((0, 0), (1, 1), (0, 0)))

    out = pl.pallas_call(
        _inos_fused_kernel,
        out_shape=jax.ShapeDtypeStruct((B, nc1), jnp.float32),
        scratch_shapes=[
            pltpu.VMEM((B, H // 2 + 2, (W // 2) * 8), jnp.float32),  # conv2 in
            pltpu.VMEM((4, B, 64), jnp.float32),                     # features
        ],
    )(xp1, params["w1c"], params["b1c"], params["w2c"], params["b2c"],
      params["wfc1"], params["bfc1"], params["wfc2"], params["bfc2"],
      params["wh"], params["bh"])

    num_classes = nc1 - 1
    return out[:, :num_classes], out[:, num_classes:]


# ----------------------------- pure-JAX reference ---------------------------


def _reference_forward(raw, x):
    def conv3x3(h, w, b):
        y = jax.lax.conv_general_dilated(
            h, w, window_strides=(1, 1), padding="SAME",
            dimension_numbers=("NCHW", "OIHW", "NCHW"))
        return y + b[None, :, None, None]

    def pool2(h):
        return jax.lax.reduce_window(h, -jnp.inf, jax.lax.max,
                                     (1, 1, 2, 2), (1, 1, 2, 2), "VALID")

    h = pool2(jax.nn.relu(conv3x3(x, raw["k1"], raw["b1"])))
    h = pool2(jax.nn.relu(conv3x3(h, raw["k2"], raw["b2"])))
    h = h.reshape(h.shape[0], -1)                      # NCHW flatten (c, h, w)
    h = jax.nn.relu(h @ raw["fc1_w"] + raw["fc1_b"])
    h = jax.nn.relu(h @ raw["fc2_w"] + raw["fc2_b"])
    return h @ raw["cls_w"] + raw["cls_b"], h @ raw["inos_w"] + raw["inos_b"]


# ---------------------------------- driver ----------------------------------

if __name__ == "__main__":
    key = jax.random.PRNGKey(0)
    k_param, k_input = jax.random.split(key)

    num_classes = 10
    params, raw = init_params(k_param, num_classes=num_classes)

    x = jax.random.normal(k_input, (2, 3, 16, 16), dtype=jnp.float32)  # NCHW

    c_x, r_x = jax.jit(inos_forward)(params, x)
    jax.block_until_ready((c_x, r_x))

    assert c_x.shape == (2, num_classes), c_x.shape
    assert r_x.shape == (2, 1), r_x.shape

    # correctness vs. a pure-JAX f32 reference (kernel uses bf16 operands).
    c_ref, r_ref = _reference_forward(raw, x)
    np.testing.assert_allclose(np.asarray(c_x), np.asarray(c_ref),
                               rtol=5e-2, atol=5e-2)
    np.testing.assert_allclose(np.asarray(r_x), np.asarray(r_ref),
                               rtol=5e-2, atol=5e-2)

    print("KERNEL_OK")
</pallas_src>

<mosaic_0001>
module attributes {stable_mosaic.version = 11 : i64} {
  func.func @_inos_fused_kernel(%arg0: memref<2x18x48xf32, #tpu.memory_space<vmem>>, %arg1: memref<6x48x64xbf16, #tpu.memory_space<vmem>>, %arg2: memref<1x64xf32, #tpu.memory_space<vmem>>, %arg3: memref<6x64x64xbf16, #tpu.memory_space<vmem>>, %arg4: memref<1x64xf32, #tpu.memory_space<vmem>>, %arg5: memref<256x64xbf16, #tpu.memory_space<vmem>>, %arg6: memref<1x64xf32, #tpu.memory_space<vmem>>, %arg7: memref<64x32xbf16, #tpu.memory_space<vmem>>, %arg8: memref<1x32xf32, #tpu.memory_space<vmem>>, %arg9: memref<32x11xbf16, #tpu.memory_space<vmem>>, %arg10: memref<1x11xf32, #tpu.memory_space<vmem>>, %arg11: memref<2x11xf32, #tpu.memory_space<vmem>>, %arg12: memref<2x10x64xf32, #tpu.memory_space<vmem>>, %arg13: memref<4x2x64xf32, #tpu.memory_space<vmem>>) attributes {dimension_semantics = [], scalar_prefetch = 0 : i64, scratch_operands = 2 : i64, tpu.core_type = #tpu.core_type<tc>} {
    %cst = arith.constant 0.000000e+00 : f32
    %0 = vector.broadcast %cst : f32 to vector<2x10x64xf32>
    %c0 = arith.constant 0 : index
    %c0_0 = arith.constant 0 : index
    %c0_1 = arith.constant 0 : index
    %1 = vector.load %arg12[%c0, %c0_0, %c0_1] : memref<2x10x64xf32, #tpu.memory_space<vmem>>, vector<2x10x64xf32>
    tpu.vector_store %arg12[%c0, %c0_0, %c0_1], %0 {strides = array<i32>} : memref<2x10x64xf32, #tpu.memory_space<vmem>>, vector<2x10x64xf32>,
    %cst_2 = arith.constant 0.000000e+00 : f32
    %2 = vector.broadcast %cst_2 : f32 to vector<16x64xf32>
    %cst_3 = arith.constant 0.000000e+00 : f32
    %3 = vector.broadcast %cst_3 : f32 to vector<16x64xf32>
    %c0_4 = arith.constant 0 : index
    %c0_5 = arith.constant 0 : index
    %c0_6 = arith.constant 0 : index
    %4 = vector.load %arg0[%c0_4, %c0_5, %c0_6] : memref<2x18x48xf32, #tpu.memory_space<vmem>>, vector<1x16x48xf32>
    %5 = vector.shape_cast %4 : vector<1x16x48xf32> to vector<16x48xf32>
    %6 = arith.truncf %5 : vector<16x48xf32> to vector<16x48xbf16>
    %c0_7 = arith.constant 0 : index
    %c0_8 = arith.constant 0 : index
    %c0_9 = arith.constant 0 : index
    %7 = vector.load %arg1[%c0_7, %c0_8, %c0_9] : memref<6x48x64xbf16, #tpu.memory_space<vmem>>, vector<1x48x64xbf16>
    %8 = vector.shape_cast %7 : vector<1x48x64xbf16> to vector<48x64xbf16>
    %cst_10 = arith.constant dense<0.000000e+00> : vector<16x64xf32>
    %9 = tpu.matmul %6, %8, %cst_10 {dimension_numbers = #tpu.dot_dimension_numbers<[1], [0], [0], [1], [0, 0, 1, 1], [], []>} : vector<16x48xbf16>, vector<48x64xbf16>, vector<16x64xf32> -> vector<16x64xf32>
    %10 = arith.addf %2, %9 : vector<16x64xf32>
    %c1 = arith.constant 1 : index
    %c0_11 = arith.constant 0 : index
    %c0_12 = arith.constant 0 : index
    %11 = vector.load %arg1[%c1, %c0_11, %c0_12] : memref<6x48x64xbf16, #tpu.memory_space<vmem>>, vector<1x48x64xbf16>
    %12 = vector.shape_cast %11 : vector<1x48x64xbf16> to vector<48x64xbf16>
    %cst_13 = arith.constant dense<0.000000e+00> : vector<16x64xf32>
    %13 = tpu.matmul %6, %12, %cst_13 {dimension_numbers = #tpu.dot_dimension_numbers<[1], [0], [0], [1], [0, 0, 1, 1], [], []>} : vector<16x48xbf16>, vector<48x64xbf16>, vector<16x64xf32> -> vector<16x64xf32>
    %14 = arith.addf %3, %13 : vector<16x64xf32>
    %c0_14 = arith.constant 0 : index
    %c1_15 = arith.constant 1 : index
    %c0_16 = arith.constant 0 : index
    %15 = vector.load %arg0[%c0_14, %c1_15, %c0_16] : memref<2x18x48xf32, #tpu.memory_space<vmem>>, vector<1x16x48xf32>
    %16 = vector.shape_cast %15 : vector<1x16x48xf32> to vector<16x48xf32>
    %17 = arith.truncf %16 : vector<16x48xf32> to vector<16x48xbf16>
    %c2 = arith.constant 2 : index
    %c0_17 = arith.constant 0 : index
    %c0_18 = arith.constant 0 : index
    %18 = vector.load %arg1[%c2, %c0_17, %c0_18] : memref<6x48x64xbf16, #tpu.memory_space<vmem>>, vector<1x48x64xbf16>
    %19 = vector.shape_cast %18 : vector<1x48x64xbf16> to vector<48x64xbf16>
    %cst_19 = arith.constant dense<0.000000e+00> : vector<16x64xf32>
    %20 = tpu.matmul %17, %19, %cst_19 {dimension_numbers = #tpu.dot_dimension_numbers<[1], [0], [0], [1], [0, 0, 1, 1], [], []>} : vector<16x48xbf16>, vector<48x64xbf16>, vector<16x64xf32> -> vector<16x64xf32>
    %21 = arith.addf %10, %20 : vector<16x64xf32>
    %c3 = arith.constant 3 : index
    %c0_20 = arith.constant 0 : index
    %c0_21 = arith.constant 0 : index
    %22 = vector.load %arg1[%c3, %c0_20, %c0_21] : memref<6x48x64xbf16, #tpu.memory_space<vmem>>, vector<1x48x64xbf16>
    %23 = vector.shape_cast %22 : vector<1x48x64xbf16> to vector<48x64xbf16>
    %cst_22 = arith.constant dense<0.000000e+00> : vector<16x64xf32>
    %24 = tpu.matmul %17, %23, %cst_22 {dimension_numbers = #tpu.dot_dimension_numbers<[1], [0], [0], [1], [0, 0, 1, 1], [], []>} : vector<16x48xbf16>, vector<48x64xbf16>, vector<16x64xf32> -> vector<16x64xf32>
    %25 = arith.addf %14, %24 : vector<16x64xf32>
    %c0_23 = arith.constant 0 : index
    %c2_24 = arith.constant 2 : index
    %c0_25 = arith.constant 0 : index
    %26 = vector.load %arg0[%c0_23, %c2_24, %c0_25] : memref<2x18x48xf32, #tpu.memory_space<vmem>>, vector<1x16x48xf32>
    %27 = vector.shape_cast %26 : vector<1x16x48xf32> to vector<16x48xf32>
    %28 = arith.truncf %27 : vector<16x48xf32> to vector<16x48xbf16>
    %c4 = arith.constant 4 : index
    %c0_26 = arith.constant 0 : index
    %c0_27 = arith.constant 0 : index
    %29 = vector.load %arg1[%c4, %c0_26, %c0_27] : memref<6x48x64xbf16, #tpu.memory_space<vmem>>, vector<1x48x64xbf16>
    %30 = vector.shape_cast %29 : vector<1x48x64xbf16> to vector<48x64xbf16>
    %cst_28 = arith.constant dense<0.000000e+00> : vector<16x64xf32>
    %31 = tpu.matmul %28, %30, %cst_28 {dimension_numbers = #tpu.dot_dimension_numbers<[1], [0], [0], [1], [0, 0, 1, 1], [], []>} : vector<16x48xbf16>, vector<48x64xbf16>, vector<16x64xf32> -> vector<16x64xf32>
    %32 = arith.addf %21, %31 : vector<16x64xf32>
    %c5 = arith.constant 5 : index
    %c0_29 = arith.constant 0 : index
    %c0_30 = arith.constant 0 : index
    %33 = vector.load %arg1[%c5, %c0_29, %c0_30] : memref<6x48x64xbf16, #tpu.memory_space<vmem>>, vector<1x48x64xbf16>
    %34 = vector.shape_cast %33 : vector<1x48x64xbf16> to vector<48x64xbf16>
    %cst_31 = arith.constant dense<0.000000e+00> : vector<16x64xf32>
    %35 = tpu.matmul %28, %34, %cst_31 {dimension_numbers = #tpu.dot_dimension_numbers<[1], [0], [0], [1], [0, 0, 1, 1], [], []>} : vector<16x48xbf16>, vector<48x64xbf16>, vector<16x64xf32> -> vector<16x64xf32>
    %36 = arith.addf %25, %35 : vector<16x64xf32>
    %37 = arith.maximumf %32, %36 : vector<16x64xf32>
    %c0_32 = arith.constant 0 : index
    %c0_33 = arith.constant 0 : index
    %38 = vector.load %arg2[%c0_32, %c0_33] : memref<1x64xf32, #tpu.memory_space<vmem>>, vector<1x64xf32>
    %39 = vector.broadcast %38 : vector<1x64xf32> to vector<16x64xf32>
    %40 = arith.addf %37, %39 : vector<16x64xf32>
    %cst_34 = arith.constant 0.000000e+00 : f32
    %41 = vector.broadcast %cst_34 : f32 to vector<16x64xf32>
    %42 = arith.maximumf %40, %41 : vector<16x64xf32>
    %43 = vector.extract_strided_slice %42 {offsets = [0, 0], sizes = [1, 64], strides = [1, 1]} : vector<16x64xf32> to vector<1x64xf32>
    %44 = vector.extract_strided_slice %42 {offsets = [1, 0], sizes = [1, 64], strides = [1, 1]} : vector<16x64xf32> to vector<1x64xf32>
    %45 = arith.maximumf %43, %44 : vector<1x64xf32>
    %c0_35 = arith.constant 0 : index
    %c1_36 = arith.constant 1 : index
    %c0_37 = arith.constant 0 : index
    %46 = vector.load %arg12[%c0_35, %c1_36, %c0_37] : memref<2x10x64xf32, #tpu.memory_space<vmem>>, vector<1x1x64xf32>
    %47 = vector.shape_cast %46 : vector<1x1x64xf32> to vector<1x64xf32>
    %48 = vector.shape_cast %45 : vector<1x64xf32> to vector<1x1x64xf32>
    tpu.vector_store %arg12[%c0_35, %c1_36, %c0_37], %48 {strides = array<i32>} : memref<2x10x64xf32, #tpu.memory_space<vmem>>, vector<1x1x64xf32>,
    %49 = vector.extract_strided_slice %42 {offsets = [2, 0], sizes = [1, 64], strides = [1, 1]} : vector<16x64xf32> to vector<1x64xf32>
    %50 = vector.extract_strided_slice %42 {offsets = [3, 0], sizes = [1, 64], strides = [1, 1]} : vector<16x64xf32> to vector<1x64xf32>
    %51 = arith.maximumf %49, %50 : vector<1x64xf32>
    %c0_38 = arith.constant 0 : index
    %c2_39 = arith.constant 2 : index
    %c0_40 = arith.constant 0 : index
    %52 = vector.load %arg12[%c0_38, %c2_39, %c0_40] : memref<2x10x64xf32, #tpu.memory_space<vmem>>, vector<1x1x64xf32>
    %53 = vector.shape_cast %52 : vector<1x1x64xf32> to vector<1x64xf32>
    %54 = vector.shape_cast %51 : vector<1x64xf32> to vector<1x1x64xf32>
    tpu.vector_store %arg12[%c0_38, %c2_39, %c0_40], %54 {strides = array<i32>} : memref<2x10x64xf32, #tpu.memory_space<vmem>>, vector<1x1x64xf32>,
    %55 = vector.extract_strided_slice %42 {offsets = [4, 0], sizes = [1, 64], strides = [1, 1]} : vector<16x64xf32> to vector<1x64xf32>
    %56 = vector.extract_strided_slice %42 {offsets = [5, 0], sizes = [1, 64], strides = [1, 1]} : vector<16x64xf32> to vector<1x64xf32>
    %57 = arith.maximumf %55, %56 : vector<1x64xf32>
    %c0_41 = arith.constant 0 : index
    %c3_42 = arith.constant 3 : index
    %c0_43 = arith.constant 0 : index
    %58 = vector.load %arg12[%c0_41, %c3_42, %c0_43] : memref<2x10x64xf32, #tpu.memory_space<vmem>>, vector<1x1x64xf32>
    %59 = vector.shape_cast %58 : vector<1x1x64xf32> to vector<1x64xf32>
    %60 = vector.shape_cast %57 : vector<1x64xf32> to vector<1x1x64xf32>
    tpu.vector_store %arg12[%c0_41, %c3_42, %c0_43], %60 {strides = array<i32>} : memref<2x10x64xf32, #tpu.memory_space<vmem>>, vector<1x1x64xf32>,
    %61 = vector.extract_strided_slice %42 {offsets = [6, 0], sizes = [1, 64], strides = [1, 1]} : vector<16x64xf32> to vector<1x64xf32>
    %62 = vector.extract_strided_slice %42 {offsets = [7, 0], sizes = [1, 64], strides = [1, 1]} : vector<16x64xf32> to vector<1x64xf32>
    %63 = arith.maximumf %61, %62 : vector<1x64xf32>
    %c0_44 = arith.constant 0 : index
    %c4_45 = arith.constant 4 : index
    %c0_46 = arith.constant 0 : index
    %64 = vector.load %arg12[%c0_44, %c4_45, %c0_46] : memref<2x10x64xf32, #tpu.memory_space<vmem>>, vector<1x1x64xf32>
    %65 = vector.shape_cast %64 : vector<1x1x64xf32> to vector<1x64xf32>
    %66 = vector.shape_cast %63 : vector<1x64xf32> to vector<1x1x64xf32>
    tpu.vector_store %arg12[%c0_44, %c4_45, %c0_46], %66 {strides = array<i32>} : memref<2x10x64xf32, #tpu.memory_space<vmem>>, vector<1x1x64xf32>,
    %67 = vector.extract_strided_slice %42 {offsets = [8, 0], sizes = [1, 64], strides = [1, 1]} : vector<16x64xf32> to vector<1x64xf32>
    %68 = vector.extract_strided_slice %42 {offsets = [9, 0], sizes = [1, 64], strides = [1, 1]} : vector<16x64xf32> to vector<1x64xf32>
    %69 = arith.maximumf %67, %68 : vector<1x64xf32>
    %c0_47 = arith.constant 0 : index
    %c5_48 = arith.constant 5 : index
    %c0_49 = arith.constant 0 : index
    %70 = vector.load %arg12[%c0_47, %c5_48, %c0_49] : memref<2x10x64xf32, #tpu.memory_space<vmem>>, vector<1x1x64xf32>
    %71 = vector.shape_cast %70 : vector<1x1x64xf32> to vector<1x64xf32>
    %72 = vector.shape_cast %69 : vector<1x64xf32> to vector<1x1x64xf32>
    tpu.vector_store %arg12[%c0_47, %c5_48, %c0_49], %72 {strides = array<i32>} : memref<2x10x64xf32, #tpu.memory_space<vmem>>, vector<1x1x64xf32>,
    %73 = vector.extract_strided_slice %42 {offsets = [10, 0], sizes = [1, 64], strides = [1, 1]} : vector<16x64xf32> to vector<1x64xf32>
    %74 = vector.extract_strided_slice %42 {offsets = [11, 0], sizes = [1, 64], strides = [1, 1]} : vector<16x64xf32> to vector<1x64xf32>
    %75 = arith.maximumf %73, %74 : vector<1x64xf32>
    %c0_50 = arith.constant 0 : index
    %c6 = arith.constant 6 : index
    %c0_51 = arith.constant 0 : index
    %76 = vector.load %arg12[%c0_50, %c6, %c0_51] : memref<2x10x64xf32, #tpu.memory_space<vmem>>, vector<1x1x64xf32>
    %77 = vector.shape_cast %76 : vector<1x1x64xf32> to vector<1x64xf32>
    %78 = vector.shape_cast %75 : vector<1x64xf32> to vector<1x1x64xf32>
    tpu.vector_store %arg12[%c0_50, %c6, %c0_51], %78 {strides = array<i32>} : memref<2x10x64xf32, #tpu.memory_space<vmem>>, vector<1x1x64xf32>,
    %79 = vector.extract_strided_slice %42 {offsets = [12, 0], sizes = [1, 64], strides = [1, 1]} : vector<16x64xf32> to vector<1x64xf32>
    %80 = vector.extract_strided_slice %42 {offsets = [13, 0], sizes = [1, 64], strides = [1, 1]} : vector<16x64xf32> to vector<1x64xf32>
    %81 = arith.maximumf %79, %80 : vector<1x64xf32>
    %c0_52 = arith.constant 0 : index
    %c7 = arith.constant 7 : index
    %c0_53 = arith.constant 0 : index
    %82 = vector.load %arg12[%c0_52, %c7, %c0_53] : memref<2x10x64xf32, #tpu.memory_space<vmem>>, vector<1x1x64xf32>
    %83 = vector.shape_cast %82 : vector<1x1x64xf32> to vector<1x64xf32>
    %84 = vector.shape_cast %81 : vector<1x64xf32> to vector<1x1x64xf32>
    tpu.vector_store %arg12[%c0_52, %c7, %c0_53], %84 {strides = array<i32>} : memref<2x10x64xf32, #tpu.memory_space<vmem>>, vector<1x1x64xf32>,
    %85 = vector.extract_strided_slice %42 {offsets = [14, 0], sizes = [1, 64], strides = [1, 1]} : vector<16x64xf32> to vector<1x64xf32>
    %86 = vector.extract_strided_slice %42 {offsets = [15, 0], sizes = [1, 64], strides = [1, 1]} : vector<16x64xf32> to vector<1x64xf32>
    %87 = arith.maximumf %85, %86 : vector<1x64xf32>
    %c0_54 = arith.constant 0 : index
    %c8 = arith.constant 8 : index
    %c0_55 = arith.constant 0 : index
    %88 = vector.load %arg12[%c0_54, %c8, %c0_55] : memref<2x10x64xf32, #tpu.memory_space<vmem>>, vector<1x1x64xf32>
    %89 = vector.shape_cast %88 : vector<1x1x64xf32> to vector<1x64xf32>
    %90 = vector.shape_cast %87 : vector<1x64xf32> to vector<1x1x64xf32>
    tpu.vector_store %arg12[%c0_54, %c8, %c0_55], %90 {strides = array<i32>} : memref<2x10x64xf32, #tpu.memory_space<vmem>>, vector<1x1x64xf32>,
    %cst_56 = arith.constant 0.000000e+00 : f32
    %91 = vector.broadcast %cst_56 : f32 to vector<16x64xf32>
    %cst_57 = arith.constant 0.000000e+00 : f32
    %92 = vector.broadcast %cst_57 : f32 to vector<16x64xf32>
    %c1_58 = arith.constant 1 : index
    %c0_59 = arith.constant 0 : index
    %c0_60 = arith.constant 0 : index
    %93 = vector.load %arg0[%c1_58, %c0_59, %c0_60] : memref<2x18x48xf32, #tpu.memory_space<vmem>>, vector<1x16x48xf32>
    %94 = vector.shape_cast %93 : vector<1x16x48xf32> to vector<16x48xf32>
    %95 = arith.truncf %94 : vector<16x48xf32> to vector<16x48xbf16>
    %c0_61 = arith.constant 0 : index
    %c0_62 = arith.constant 0 : index
    %c0_63 = arith.constant 0 : index
    %96 = vector.load %arg1[%c0_61, %c0_62, %c0_63] : memref<6x48x64xbf16, #tpu.memory_space<vmem>>, vector<1x48x64xbf16>
    %97 = vector.shape_cast %96 : vector<1x48x64xbf16> to vector<48x64xbf16>
    %cst_64 = arith.constant dense<0.000000e+00> : vector<16x64xf32>
    %98 = tpu.matmul %95, %97, %cst_64 {dimension_numbers = #tpu.dot_dimension_numbers<[1], [0], [0], [1], [0, 0, 1, 1], [], []>} : vector<16x48xbf16>, vector<48x64xbf16>, vector<16x64xf32> -> vector<16x64xf32>
    %99 = arith.addf %91, %98 : vector<16x64xf32>
    %c1_65 = arith.constant 1 : index
    %c0_66 = arith.constant 0 : index
    %c0_67 = arith.constant 0 : index
    %100 = vector.load %arg1[%c1_65, %c0_66, %c0_67] : memref<6x48x64xbf16, #tpu.memory_space<vmem>>, vector<1x48x64xbf16>
    %101 = vector.shape_cast %100 : vector<1x48x64xbf16> to vector<48x64xbf16>
    %cst_68 = arith.constant dense<0.000000e+00> : vector<16x64xf32>
    %102 = tpu.matmul %95, %101, %cst_68 {dimension_numbers = #tpu.dot_dimension_numbers<[1], [0], [0], [1], [0, 0, 1, 1], [], []>} : vector<16x48xbf16>, vector<48x64xbf16>, vector<16x64xf32> -> vector<16x64xf32>
    %103 = arith.addf %92, %102 : vector<16x64xf32>
    %c1_69 = arith.constant 1 : index
    %c1_70 = arith.constant 1 : index
    %c0_71 = arith.constant 0 : index
    %104 = vector.load %arg0[%c1_69, %c1_70, %c0_71] : memref<2x18x48xf32, #tpu.memory_space<vmem>>, vector<1x16x48xf32>
    %105 = vector.shape_cast %104 : vector<1x16x48xf32> to vector<16x48xf32>
    %106 = arith.truncf %105 : vector<16x48xf32> to vector<16x48xbf16>
    %c2_72 = arith.constant 2 : index
    %c0_73 = arith.constant 0 : index
    %c0_74 = arith.constant 0 : index
    %107 = vector.load %arg1[%c2_72, %c0_73, %c0_74] : memref<6x48x64xbf16, #tpu.memory_space<vmem>>, vector<1x48x64xbf16>
    %108 = vector.shape_cast %107 : vector<1x48x64xbf16> to vector<48x64xbf16>
    %cst_75 = arith.constant dense<0.000000e+00> : vector<16x64xf32>
    %109 = tpu.matmul %106, %108, %cst_75 {dimension_numbers = #tpu.dot_dimension_numbers<[1], [0], [0], [1], [0, 0, 1, 1], [], []>} : vector<16x48xbf16>, vector<48x64xbf16>, vector<16x64xf32> -> vector<16x64xf32>
    %110 = arith.addf %99, %109 : vector<16x64xf32>
    %c3_76 = arith.constant 3 : index
    %c0_77 = arith.constant 0 : index
    %c0_78 = arith.constant 0 : index
    %111 = vector.load %arg1[%c3_76, %c0_77, %c0_78] : memref<6x48x64xbf16, #tpu.memory_space<vmem>>, vector<1x48x64xbf16>
    %112 = vector.shape_cast %111 : vector<1x48x64xbf16> to vector<48x64xbf16>
    %cst_79 = arith.constant dense<0.000000e+00> : vector<16x64xf32>
    %113 = tpu.matmul %106, %112, %cst_79 {dimension_numbers = #tpu.dot_dimension_numbers<[1], [0], [0], [1], [0, 0, 1, 1], [], []>} : vector<16x48xbf16>, vector<48x64xbf16>, vector<16x64xf32> -> vector<16x64xf32>
    %114 = arith.addf %103, %113 : vector<16x64xf32>
    %c1_80 = arith.constant 1 : index
    %c2_81 = arith.constant 2 : index
    %c0_82 = arith.constant 0 : index
    %115 = vector.load %arg0[%c1_80, %c2_81, %c0_82] : memref<2x18x48xf32, #tpu.memory_space<vmem>>, vector<1x16x48xf32>
    %116 = vector.shape_cast %115 : vector<1x16x48xf32> to vector<16x48xf32>
    %117 = arith.truncf %116 : vector<16x48xf32> to vector<16x48xbf16>
    %c4_83 = arith.constant 4 : index
    %c0_84 = arith.constant 0 : index
    %c0_85 = arith.constant 0 : index
    %118 = vector.load %arg1[%c4_83, %c0_84, %c0_85] : memref<6x48x64xbf16, #tpu.memory_space<vmem>>, vector<1x48x64xbf16>
    %119 = vector.shape_cast %118 : vector<1x48x64xbf16> to vector<48x64xbf16>
    %cst_86 = arith.constant dense<0.000000e+00> : vector<16x64xf32>
    %120 = tpu.matmul %117, %119, %cst_86 {dimension_numbers = #tpu.dot_dimension_numbers<[1], [0], [0], [1], [0, 0, 1, 1], [], []>} : vector<16x48xbf16>, vector<48x64xbf16>, vector<16x64xf32> -> vector<16x64xf32>
    %121 = arith.addf %110, %120 : vector<16x64xf32>
    %c5_87 = arith.constant 5 : index
    %c0_88 = arith.constant 0 : index
    %c0_89 = arith.constant 0 : index
    %122 = vector.load %arg1[%c5_87, %c0_88, %c0_89] : memref<6x48x64xbf16, #tpu.memory_space<vmem>>, vector<1x48x64xbf16>
    %123 = vector.shape_cast %122 : vector<1x48x64xbf16> to vector<48x64xbf16>
    %cst_90 = arith.constant dense<0.000000e+00> : vector<16x64xf32>
    %124 = tpu.matmul %117, %123, %cst_90 {dimension_numbers = #tpu.dot_dimension_numbers<[1], [0], [0], [1], [0, 0, 1, 1], [], []>} : vector<16x48xbf16>, vector<48x64xbf16>, vector<16x64xf32> -> vector<16x64xf32>
    %125 = arith.addf %114, %124 : vector<16x64xf32>
    %126 = arith.maximumf %121, %125 : vector<16x64xf32>
    %c0_91 = arith.constant 0 : index
    %c0_92 = arith.constant 0 : index
    %127 = vector.load %arg2[%c0_91, %c0_92] : memref<1x64xf32, #tpu.memory_space<vmem>>, vector<1x64xf32>
    %128 = vector.broadcast %127 : vector<1x64xf32> to vector<16x64xf32>
    %129 = arith.addf %126, %128 : vector<16x64xf32>
    %cst_93 = arith.constant 0.000000e+00 : f32
    %130 = vector.broadcast %cst_93 : f32 to vector<16x64xf32>
    %131 = arith.maximumf %129, %130 : vector<16x64xf32>
    %132 = vector.extract_strided_slice %131 {offsets = [0, 0], sizes = [1, 64], strides = [1, 1]} : vector<16x64xf32> to vector<1x64xf32>
    %133 = vector.extract_strided_slice %131 {offsets = [1, 0], sizes = [1, 64], strides = [1, 1]} : vector<16x64xf32> to vector<1x64xf32>
    %134 = arith.maximumf %132, %133 : vector<1x64xf32>
    %c1_94 = arith.constant 1 : index
    %c1_95 = arith.constant 1 : index
    %c0_96 = arith.constant 0 : index
    %135 = vector.load %arg12[%c1_94, %c1_95, %c0_96] : memref<2x10x64xf32, #tpu.memory_space<vmem>>, vector<1x1x64xf32>
    %136 = vector.shape_cast %135 : vector<1x1x64xf32> to vector<1x64xf32>
    %137 = vector.shape_cast %134 : vector<1x64xf32> to vector<1x1x64xf32>
    tpu.vector_store %arg12[%c1_94, %c1_95, %c0_96], %137 {strides = array<i32>} : memref<2x10x64xf32, #tpu.memory_space<vmem>>, vector<1x1x64xf32>,
    %138 = vector.extract_strided_slice %131 {offsets = [2, 0], sizes = [1, 64], strides = [1, 1]} : vector<16x64xf32> to vector<1x64xf32>
    %139 = vector.extract_strided_slice %131 {offsets = [3, 0], sizes = [1, 64], strides = [1, 1]} : vector<16x64xf32> to vector<1x64xf32>
    %140 = arith.maximumf %138, %139 : vector<1x64xf32>
    %c1_97 = arith.constant 1 : index
    %c2_98 = arith.constant 2 : index
    %c0_99 = arith.constant 0 : index
    %141 = vector.load %arg12[%c1_97, %c2_98, %c0_99] : memref<2x10x64xf32, #tpu.memory_space<vmem>>, vector<1x1x64xf32>
    %142 = vector.shape_cast %141 : vector<1x1x64xf32> to vector<1x64xf32>
    %143 = vector.shape_cast %140 : vector<1x64xf32> to vector<1x1x64xf32>
    tpu.vector_store %arg12[%c1_97, %c2_98, %c0_99], %143 {strides = array<i32>} : memref<2x10x64xf32, #tpu.memory_space<vmem>>, vector<1x1x64xf32>,
    %144 = vector.extract_strided_slice %131 {offsets = [4, 0], sizes = [1, 64], strides = [1, 1]} : vector<16x64xf32> to vector<1x64xf32>
    %145 = vector.extract_strided_slice %131 {offsets = [5, 0], sizes = [1, 64], strides = [1, 1]} : vector<16x64xf32> to vector<1x64xf32>
    %146 = arith.maximumf %144, %145 : vector<1x64xf32>
    %c1_100 = arith.constant 1 : index
    %c3_101 = arith.constant 3 : index
    %c0_102 = arith.constant 0 : index
    %147 = vector.load %arg12[%c1_100, %c3_101, %c0_102] : memref<2x10x64xf32, #tpu.memory_space<vmem>>, vector<1x1x64xf32>
    %148 = vector.shape_cast %147 : vector<1x1x64xf32> to vector<1x64xf32>
    %149 = vector.shape_cast %146 : vector<1x64xf32> to vector<1x1x64xf32>
    tpu.vector_store %arg12[%c1_100, %c3_101, %c0_102], %149 {strides = array<i32>} : memref<2x10x64xf32, #tpu.memory_space<vmem>>, vector<1x1x64xf32>,
    %150 = vector.extract_strided_slice %131 {offsets = [6, 0], sizes = [1, 64], strides = [1, 1]} : vector<16x64xf32> to vector<1x64xf32>
    %151 = vector.extract_strided_slice %131 {offsets = [7, 0], sizes = [1, 64], strides = [1, 1]} : vector<16x64xf32> to vector<1x64xf32>
    %152 = arith.maximumf %150, %151 : vector<1x64xf32>
    %c1_103 = arith.constant 1 : index
    %c4_104 = arith.constant 4 : index
    %c0_105 = arith.constant 0 : index
    %153 = vector.load %arg12[%c1_103, %c4_104, %c0_105] : memref<2x10x64xf32, #tpu.memory_space<vmem>>, vector<1x1x64xf32>
    %154 = vector.shape_cast %153 : vector<1x1x64xf32> to vector<1x64xf32>
    %155 = vector.shape_cast %152 : vector<1x64xf32> to vector<1x1x64xf32>
    tpu.vector_store %arg12[%c1_103, %c4_104, %c0_105], %155 {strides = array<i32>} : memref<2x10x64xf32, #tpu.memory_space<vmem>>, vector<1x1x64xf32>,
    %156 = vector.extract_strided_slice %131 {offsets = [8, 0], sizes = [1, 64], strides = [1, 1]} : vector<16x64xf32> to vector<1x64xf32>
    %157 = vector.extract_strided_slice %131 {offsets = [9, 0], sizes = [1, 64], strides = [1, 1]} : vector<16x64xf32> to vector<1x64xf32>
    %158 = arith.maximumf %156, %157 : vector<1x64xf32>
    %c1_106 = arith.constant 1 : index
    %c5_107 = arith.constant 5 : index
    %c0_108 = arith.constant 0 : index
    %159 = vector.load %arg12[%c1_106, %c5_107, %c0_108] : memref<2x10x64xf32, #tpu.memory_space<vmem>>, vector<1x1x64xf32>
    %160 = vector.shape_cast %159 : vector<1x1x64xf32> to vector<1x64xf32>
    %161 = vector.shape_cast %158 : vector<1x64xf32> to vector<1x1x64xf32>
    tpu.vector_store %arg12[%c1_106, %c5_107, %c0_108], %161 {strides = array<i32>} : memref<2x10x64xf32, #tpu.memory_space<vmem>>, vector<1x1x64xf32>,
    %162 = vector.extract_strided_slice %131 {offsets = [10, 0], sizes = [1, 64], strides = [1, 1]} : vector<16x64xf32> to vector<1x64xf32>
    %163 = vector.extract_strided_slice %131 {offsets = [11, 0], sizes = [1, 64], strides = [1, 1]} : vector<16x64xf32> to vector<1x64xf32>
    %164 = arith.maximumf %162, %163 : vector<1x64xf32>
    %c1_109 = arith.constant 1 : index
    %c6_110 = arith.constant 6 : index
    %c0_111 = arith.constant 0 : index
    %165 = vector.load %arg12[%c1_109, %c6_110, %c0_111] : memref<2x10x64xf32, #tpu.memory_space<vmem>>, vector<1x1x64xf32>
    %166 = vector.shape_cast %165 : vector<1x1x64xf32> to vector<1x64xf32>
    %167 = vector.shape_cast %164 : vector<1x64xf32> to vector<1x1x64xf32>
    tpu.vector_store %arg12[%c1_109, %c6_110, %c0_111], %167 {strides = array<i32>} : memref<2x10x64xf32, #tpu.memory_space<vmem>>, vector<1x1x64xf32>,
    %168 = vector.extract_strided_slice %131 {offsets = [12, 0], sizes = [1, 64], strides = [1, 1]} : vector<16x64xf32> to vector<1x64xf32>
    %169 = vector.extract_strided_slice %131 {offsets = [13, 0], sizes = [1, 64], strides = [1, 1]} : vector<16x64xf32> to vector<1x64xf32>
    %170 = arith.maximumf %168, %169 : vector<1x64xf32>
    %c1_112 = arith.constant 1 : index
    %c7_113 = arith.constant 7 : index
    %c0_114 = arith.constant 0 : index
    %171 = vector.load %arg12[%c1_112, %c7_113, %c0_114] : memref<2x10x64xf32, #tpu.memory_space<vmem>>, vector<1x1x64xf32>
    %172 = vector.shape_cast %171 : vector<1x1x64xf32> to vector<1x64xf32>
    %173 = vector.shape_cast %170 : vector<1x64xf32> to vector<1x1x64xf32>
    tpu.vector_store %arg12[%c1_112, %c7_113, %c0_114], %173 {strides = array<i32>} : memref<2x10x64xf32, #tpu.memory_space<vmem>>, vector<1x1x64xf32>,
    %174 = vector.extract_strided_slice %131 {offsets = [14, 0], sizes = [1, 64], strides = [1, 1]} : vector<16x64xf32> to vector<1x64xf32>
    %175 = vector.extract_strided_slice %131 {offsets = [15, 0], sizes = [1, 64], strides = [1, 1]} : vector<16x64xf32> to vector<1x64xf32>
    %176 = arith.maximumf %174, %175 : vector<1x64xf32>
    %c1_115 = arith.constant 1 : index
    %c8_116 = arith.constant 8 : index
    %c0_117 = arith.constant 0 : index
    %177 = vector.load %arg12[%c1_115, %c8_116, %c0_117] : memref<2x10x64xf32, #tpu.memory_space<vmem>>, vector<1x1x64xf32>
    %178 = vector.shape_cast %177 : vector<1x1x64xf32> to vector<1x64xf32>
    %179 = vector.shape_cast %176 : vector<1x64xf32> to vector<1x1x64xf32>
    tpu.vector_store %arg12[%c1_115, %c8_116, %c0_117], %179 {strides = array<i32>} : memref<2x10x64xf32, #tpu.memory_space<vmem>>, vector<1x1x64xf32>,
    %cst_118 = arith.constant 0.000000e+00 : f32
    %180 = vector.broadcast %cst_118 : f32 to vector<8x64xf32>
    %cst_119 = arith.constant 0.000000e+00 : f32
    %181 = vector.broadcast %cst_119 : f32 to vector<8x64xf32>
    %c0_120 = arith.constant 0 : index
    %c0_121 = arith.constant 0 : index
    %c0_122 = arith.constant 0 : index
    %182 = vector.load %arg12[%c0_120, %c0_121, %c0_122] : memref<2x10x64xf32, #tpu.memory_space<vmem>>, vector<1x8x64xf32>
    %183 = vector.shape_cast %182 : vector<1x8x64xf32> to vector<8x64xf32>
    %184 = arith.truncf %183 : vector<8x64xf32> to vector<8x64xbf16>
    %c0_123 = arith.constant 0 : index
    %c0_124 = arith.constant 0 : index
    %c0_125 = arith.constant 0 : index
    %185 = vector.load %arg3[%c0_123, %c0_124, %c0_125] : memref<6x64x64xbf16, #tpu.memory_space<vmem>>, vector<1x64x64xbf16>
    %186 = vector.shape_cast %185 : vector<1x64x64xbf16> to vector<64x64xbf16>
    %cst_126 = arith.constant dense<0.000000e+00> : vector<8x64xf32>
    %187 = tpu.matmul %184, %186, %cst_126 {dimension_numbers = #tpu.dot_dimension_numbers<[1], [0], [0], [1], [0, 0, 1, 1], [], []>} : vector<8x64xbf16>, vector<64x64xbf16>, vector<8x64xf32> -> vector<8x64xf32>
    %188 = arith.addf %180, %187 : vector<8x64xf32>
    %c1_127 = arith.constant 1 : index
    %c0_128 = arith.constant 0 : index
    %c0_129 = arith.constant 0 : index
    %189 = vector.load %arg3[%c1_127, %c0_128, %c0_129] : memref<6x64x64xbf16, #tpu.memory_space<vmem>>, vector<1x64x64xbf16>
    %190 = vector.shape_cast %189 : vector<1x64x64xbf16> to vector<64x64xbf16>
    %cst_130 = arith.constant dense<0.000000e+00> : vector<8x64xf32>
    %191 = tpu.matmul %184, %190, %cst_130 {dimension_numbers = #tpu.dot_dimension_numbers<[1], [0], [0], [1], [0, 0, 1, 1], [], []>} : vector<8x64xbf16>, vector<64x64xbf16>, vector<8x64xf32> -> vector<8x64xf32>
    %192 = arith.addf %181, %191 : vector<8x64xf32>
    %c0_131 = arith.constant 0 : index
    %c1_132 = arith.constant 1 : index
    %c0_133 = arith.constant 0 : index
    %193 = vector.load %arg12[%c0_131, %c1_132, %c0_133] : memref<2x10x64xf32, #tpu.memory_space<vmem>>, vector<1x8x64xf32>
    %194 = vector.shape_cast %193 : vector<1x8x64xf32> to vector<8x64xf32>
    %195 = arith.truncf %194 : vector<8x64xf32> to vector<8x64xbf16>
    %c2_134 = arith.constant 2 : index
    %c0_135 = arith.constant 0 : index
    %c0_136 = arith.constant 0 : index
    %196 = vector.load %arg3[%c2_134, %c0_135, %c0_136] : memref<6x64x64xbf16, #tpu.memory_space<vmem>>, vector<1x64x64xbf16>
    %197 = vector.shape_cast %196 : vector<1x64x64xbf16> to vector<64x64xbf16>
    %cst_137 = arith.constant dense<0.000000e+00> : vector<8x64xf32>
    %198 = tpu.matmul %195, %197, %cst_137 {dimension_numbers = #tpu.dot_dimension_numbers<[1], [0], [0], [1], [0, 0, 1, 1], [], []>} : vector<8x64xbf16>, vector<64x64xbf16>, vector<8x64xf32> -> vector<8x64xf32>
    %199 = arith.addf %188, %198 : vector<8x64xf32>
    %c3_138 = arith.constant 3 : index
    %c0_139 = arith.constant 0 : index
    %c0_140 = arith.constant 0 : index
    %200 = vector.load %arg3[%c3_138, %c0_139, %c0_140] : memref<6x64x64xbf16, #tpu.memory_space<vmem>>, vector<1x64x64xbf16>
    %201 = vector.shape_cast %200 : vector<1x64x64xbf16> to vector<64x64xbf16>
    %cst_141 = arith.constant dense<0.000000e+00> : vector<8x64xf32>
    %202 = tpu.matmul %195, %201, %cst_141 {dimension_numbers = #tpu.dot_dimension_numbers<[1], [0], [0], [1], [0, 0, 1, 1], [], []>} : vector<8x64xbf16>, vector<64x64xbf16>, vector<8x64xf32> -> vector<8x64xf32>
    %203 = arith.addf %192, %202 : vector<8x64xf32>
    %c0_142 = arith.constant 0 : index
    %c2_143 = arith.constant 2 : index
    %c0_144 = arith.constant 0 : index
    %204 = vector.load %arg12[%c0_142, %c2_143, %c0_144] : memref<2x10x64xf32, #tpu.memory_space<vmem>>, vector<1x8x64xf32>
    %205 = vector.shape_cast %204 : vector<1x8x64xf32> to vector<8x64xf32>
    %206 = arith.truncf %205 : vector<8x64xf32> to vector<8x64xbf16>
    %c4_145 = arith.constant 4 : index
    %c0_146 = arith.constant 0 : index
    %c0_147 = arith.constant 0 : index
    %207 = vector.load %arg3[%c4_145, %c0_146, %c0_147] : memref<6x64x64xbf16, #tpu.memory_space<vmem>>, vector<1x64x64xbf16>
    %208 = vector.shape_cast %207 : vector<1x64x64xbf16> to vector<64x64xbf16>
    %cst_148 = arith.constant dense<0.000000e+00> : vector<8x64xf32>
    %209 = tpu.matmul %206, %208, %cst_148 {dimension_numbers = #tpu.dot_dimension_numbers<[1], [0], [0], [1], [0, 0, 1, 1], [], []>} : vector<8x64xbf16>, vector<64x64xbf16>, vector<8x64xf32> -> vector<8x64xf32>
    %210 = arith.addf %199, %209 : vector<8x64xf32>
    %c5_149 = arith.constant 5 : index
    %c0_150 = arith.constant 0 : index
    %c0_151 = arith.constant 0 : index
    %211 = vector.load %arg3[%c5_149, %c0_150, %c0_151] : memref<6x64x64xbf16, #tpu.memory_space<vmem>>, vector<1x64x64xbf16>
    %212 = vector.shape_cast %211 : vector<1x64x64xbf16> to vector<64x64xbf16>
    %cst_152 = arith.constant dense<0.000000e+00> : vector<8x64xf32>
    %213 = tpu.matmul %206, %212, %cst_152 {dimension_numbers = #tpu.dot_dimension_numbers<[1], [0], [0], [1], [0, 0, 1, 1], [], []>} : vector<8x64xbf16>, vector<64x64xbf16>, vector<8x64xf32> -> vector<8x64xf32>
    %214 = arith.addf %203, %213 : vector<8x64xf32>
    %215 = arith.maximumf %210, %214 : vector<8x64xf32>
    %c0_153 = arith.constant 0 : index
    %c0_154 = arith.constant 0 : index
    %216 = vector.load %arg4[%c0_153, %c0_154] : memref<1x64xf32, #tpu.memory_space<vmem>>, vector<1x64xf32>
    %217 = vector.broadcast %216 : vector<1x64xf32> to vector<8x64xf32>
    %218 = arith.addf %215, %217 : vector<8x64xf32>
    %cst_155 = arith.constant 0.000000e+00 : f32
    %219 = vector.broadcast %cst_155 : f32 to vector<8x64xf32>
    %220 = arith.maximumf %218, %219 : vector<8x64xf32>
    %221 = vector.extract_strided_slice %220 {offsets = [0, 0], sizes = [1, 64], strides = [1, 1]} : vector<8x64xf32> to vector<1x64xf32>
    %222 = vector.extract_strided_slice %220 {offsets = [1, 0], sizes = [1, 64], strides = [1, 1]} : vector<8x64xf32> to vector<1x64xf32>
    %223 = arith.maximumf %221, %222 : vector<1x64xf32>
    %c0_156 = arith.constant 0 : index
    %c0_157 = arith.constant 0 : index
    %c0_158 = arith.constant 0 : index
    %224 = vector.load %arg13[%c0_156, %c0_157, %c0_158] : memref<4x2x64xf32, #tpu.memory_space<vmem>>, vector<1x1x64xf32>
    %225 = vector.shape_cast %224 : vector<1x1x64xf32> to vector<1x64xf32>
    %226 = vector.shape_cast %223 : vector<1x64xf32> to vector<1x1x64xf32>
    tpu.vector_store %arg13[%c0_156, %c0_157, %c0_158], %226 {strides = array<i32>} : memref<4x2x64xf32, #tpu.memory_space<vmem>>, vector<1x1x64xf32>,
    %227 = vector.extract_strided_slice %220 {offsets = [2, 0], sizes = [1, 64], strides = [1, 1]} : vector<8x64xf32> to vector<1x64xf32>
    %228 = vector.extract_strided_slice %220 {offsets = [3, 0], sizes = [1, 64], strides = [1, 1]} : vector<8x64xf32> to vector<1x64xf32>
    %229 = arith.maximumf %227, %228 : vector<1x64xf32>
    %c1_159 = arith.constant 1 : index
    %c0_160 = arith.constant 0 : index
    %c0_161 = arith.constant 0 : index
    %230 = vector.load %arg13[%c1_159, %c0_160, %c0_161] : memref<4x2x64xf32, #tpu.memory_space<vmem>>, vector<1x1x64xf32>
    %231 = vector.shape_cast %230 : vector<1x1x64xf32> to vector<1x64xf32>
    %232 = vector.shape_cast %229 : vector<1x64xf32> to vector<1x1x64xf32>
    tpu.vector_store %arg13[%c1_159, %c0_160, %c0_161], %232 {strides = array<i32>} : memref<4x2x64xf32, #tpu.memory_space<vmem>>, vector<1x1x64xf32>,
    %233 = vector.extract_strided_slice %220 {offsets = [4, 0], sizes = [1, 64], strides = [1, 1]} : vector<8x64xf32> to vector<1x64xf32>
    %234 = vector.extract_strided_slice %220 {offsets = [5, 0], sizes = [1, 64], strides = [1, 1]} : vector<8x64xf32> to vector<1x64xf32>
    %235 = arith.maximumf %233, %234 : vector<1x64xf32>
    %c2_162 = arith.constant 2 : index
    %c0_163 = arith.constant 0 : index
    %c0_164 = arith.constant 0 : index
    %236 = vector.load %arg13[%c2_162, %c0_163, %c0_164] : memref<4x2x64xf32, #tpu.memory_space<vmem>>, vector<1x1x64xf32>
    %237 = vector.shape_cast %236 : vector<1x1x64xf32> to vector<1x64xf32>
    %238 = vector.shape_cast %235 : vector<1x64xf32> to vector<1x1x64xf32>
    tpu.vector_store %arg13[%c2_162, %c0_163, %c0_164], %238 {strides = array<i32>} : memref<4x2x64xf32, #tpu.memory_space<vmem>>, vector<1x1x64xf32>,
    %239 = vector.extract_strided_slice %220 {offsets = [6, 0], sizes = [1, 64], strides = [1, 1]} : vector<8x64xf32> to vector<1x64xf32>
    %240 = vector.extract_strided_slice %220 {offsets = [7, 0], sizes = [1, 64], strides = [1, 1]} : vector<8x64xf32> to vector<1x64xf32>
    %241 = arith.maximumf %239, %240 : vector<1x64xf32>
    %c3_165 = arith.constant 3 : index
    %c0_166 = arith.constant 0 : index
    %c0_167 = arith.constant 0 : index
    %242 = vector.load %arg13[%c3_165, %c0_166, %c0_167] : memref<4x2x64xf32, #tpu.memory_space<vmem>>, vector<1x1x64xf32>
    %243 = vector.shape_cast %242 : vector<1x1x64xf32> to vector<1x64xf32>
    %244 = vector.shape_cast %241 : vector<1x64xf32> to vector<1x1x64xf32>
    tpu.vector_store %arg13[%c3_165, %c0_166, %c0_167], %244 {strides = array<i32>} : memref<4x2x64xf32, #tpu.memory_space<vmem>>, vector<1x1x64xf32>,
    %cst_168 = arith.constant 0.000000e+00 : f32
    %245 = vector.broadcast %cst_168 : f32 to vector<8x64xf32>
    %cst_169 = arith.constant 0.000000e+00 : f32
    %246 = vector.broadcast %cst_169 : f32 to vector<8x64xf32>
    %c1_170 = arith.constant 1 : index
    %c0_171 = arith.constant 0 : index
    %c0_172 = arith.constant 0 : index
    %247 = vector.load %arg12[%c1_170, %c0_171, %c0_172] : memref<2x10x64xf32, #tpu.memory_space<vmem>>, vector<1x8x64xf32>
    %248 = vector.shape_cast %247 : vector<1x8x64xf32> to vector<8x64xf32>
    %249 = arith.truncf %248 : vector<8x64xf32> to vector<8x64xbf16>
    %c0_173 = arith.constant 0 : index
    %c0_174 = arith.constant 0 : index
    %c0_175 = arith.constant 0 : index
    %250 = vector.load %arg3[%c0_173, %c0_174, %c0_175] : memref<6x64x64xbf16, #tpu.memory_space<vmem>>, vector<1x64x64xbf16>
    %251 = vector.shape_cast %250 : vector<1x64x64xbf16> to vector<64x64xbf16>
    %cst_176 = arith.constant dense<0.000000e+00> : vector<8x64xf32>
    %252 = tpu.matmul %249, %251, %cst_176 {dimension_numbers = #tpu.dot_dimension_numbers<[1], [0], [0], [1], [0, 0, 1, 1], [], []>} : vector<8x64xbf16>, vector<64x64xbf16>, vector<8x64xf32> -> vector<8x64xf32>
    %253 = arith.addf %245, %252 : vector<8x64xf32>
    %c1_177 = arith.constant 1 : index
    %c0_178 = arith.constant 0 : index
    %c0_179 = arith.constant 0 : index
    %254 = vector.load %arg3[%c1_177, %c0_178, %c0_179] : memref<6x64x64xbf16, #tpu.memory_space<vmem>>, vector<1x64x64xbf16>
    %255 = vector.shape_cast %254 : vector<1x64x64xbf16> to vector<64x64xbf16>
    %cst_180 = arith.constant dense<0.000000e+00> : vector<8x64xf32>
    %256 = tpu.matmul %249, %255, %cst_180 {dimension_numbers = #tpu.dot_dimension_numbers<[1], [0], [0], [1], [0, 0, 1, 1], [], []>} : vector<8x64xbf16>, vector<64x64xbf16>, vector<8x64xf32> -> vector<8x64xf32>
    %257 = arith.addf %246, %256 : vector<8x64xf32>
    %c1_181 = arith.constant 1 : index
    %c1_182 = arith.constant 1 : index
    %c0_183 = arith.constant 0 : index
    %258 = vector.load %arg12[%c1_181, %c1_182, %c0_183] : memref<2x10x64xf32, #tpu.memory_space<vmem>>, vector<1x8x64xf32>
    %259 = vector.shape_cast %258 : vector<1x8x64xf32> to vector<8x64xf32>
    %260 = arith.truncf %259 : vector<8x64xf32> to vector<8x64xbf16>
    %c2_184 = arith.constant 2 : index
    %c0_185 = arith.constant 0 : index
    %c0_186 = arith.constant 0 : index
    %261 = vector.load %arg3[%c2_184, %c0_185, %c0_186] : memref<6x64x64xbf16, #tpu.memory_space<vmem>>, vector<1x64x64xbf16>
    %262 = vector.shape_cast %261 : vector<1x64x64xbf16> to vector<64x64xbf16>
    %cst_187 = arith.constant dense<0.000000e+00> : vector<8x64xf32>
    %263 = tpu.matmul %260, %262, %cst_187 {dimension_numbers = #tpu.dot_dimension_numbers<[1], [0], [0], [1], [0, 0, 1, 1], [], []>} : vector<8x64xbf16>, vector<64x64xbf16>, vector<8x64xf32> -> vector<8x64xf32>
    %264 = arith.addf %253, %263 : vector<8x64xf32>
    %c3_188 = arith.constant 3 : index
    %c0_189 = arith.constant 0 : index
    %c0_190 = arith.constant 0 : index
    %265 = vector.load %arg3[%c3_188, %c0_189, %c0_190] : memref<6x64x64xbf16, #tpu.memory_space<vmem>>, vector<1x64x64xbf16>
    %266 = vector.shape_cast %265 : vector<1x64x64xbf16> to vector<64x64xbf16>
    %cst_191 = arith.constant dense<0.000000e+00> : vector<8x64xf32>
    %267 = tpu.matmul %260, %266, %cst_191 {dimension_numbers = #tpu.dot_dimension_numbers<[1], [0], [0], [1], [0, 0, 1, 1], [], []>} : vector<8x64xbf16>, vector<64x64xbf16>, vector<8x64xf32> -> vector<8x64xf32>
    %268 = arith.addf %257, %267 : vector<8x64xf32>
    %c1_192 = arith.constant 1 : index
    %c2_193 = arith.constant 2 : index
    %c0_194 = arith.constant 0 : index
    %269 = vector.load %arg12[%c1_192, %c2_193, %c0_194] : memref<2x10x64xf32, #tpu.memory_space<vmem>>, vector<1x8x64xf32>
    %270 = vector.shape_cast %269 : vector<1x8x64xf32> to vector<8x64xf32>
    %271 = arith.truncf %270 : vector<8x64xf32> to vector<8x64xbf16>
    %c4_195 = arith.constant 4 : index
    %c0_196 = arith.constant 0 : index
    %c0_197 = arith.constant 0 : index
    %272 = vector.load %arg3[%c4_195, %c0_196, %c0_197] : memref<6x64x64xbf16, #tpu.memory_space<vmem>>, vector<1x64x64xbf16>
    %273 = vector.shape_cast %272 : vector<1x64x64xbf16> to vector<64x64xbf16>
    %cst_198 = arith.constant dense<0.000000e+00> : vector<8x64xf32>
    %274 = tpu.matmul %271, %273, %cst_198 {dimension_numbers = #tpu.dot_dimension_numbers<[1], [0], [0], [1], [0, 0, 1, 1], [], []>} : vector<8x64xbf16>, vector<64x64xbf16>, vector<8x64xf32> -> vector<8x64xf32>
    %275 = arith.addf %264, %274 : vector<8x64xf32>
    %c5_199 = arith.constant 5 : index
    %c0_200 = arith.constant 0 : index
    %c0_201 = arith.constant 0 : index
    %276 = vector.load %arg3[%c5_199, %c0_200, %c0_201] : memref<6x64x64xbf16, #tpu.memory_space<vmem>>, vector<1x64x64xbf16>
    %277 = vector.shape_cast %276 : vector<1x64x64xbf16> to vector<64x64xbf16>
    %cst_202 = arith.constant dense<0.000000e+00> : vector<8x64xf32>
    %278 = tpu.matmul %271, %277, %cst_202 {dimension_numbers = #tpu.dot_dimension_numbers<[1], [0], [0], [1], [0, 0, 1, 1], [], []>} : vector<8x64xbf16>, vector<64x64xbf16>, vector<8x64xf32> -> vector<8x64xf32>
    %279 = arith.addf %268, %278 : vector<8x64xf32>
    %280 = arith.maximumf %275, %279 : vector<8x64xf32>
    %c0_203 = arith.constant 0 : index
    %c0_204 = arith.constant 0 : index
    %281 = vector.load %arg4[%c0_203, %c0_204] : memref<1x64xf32, #tpu.memory_space<vmem>>, vector<1x64xf32>
    %282 = vector.broadcast %281 : vector<1x64xf32> to vector<8x64xf32>
    %283 = arith.addf %280, %282 : vector<8x64xf32>
    %cst_205 = arith.constant 0.000000e+00 : f32
    %284 = vector.broadcast %cst_205 : f32 to vector<8x64xf32>
    %285 = arith.maximumf %283, %284 : vector<8x64xf32>
    %286 = vector.extract_strided_slice %285 {offsets = [0, 0], sizes = [1, 64], strides = [1, 1]} : vector<8x64xf32> to vector<1x64xf32>
    %287 = vector.extract_strided_slice %285 {offsets = [1, 0], sizes = [1, 64], strides = [1, 1]} : vector<8x64xf32> to vector<1x64xf32>
    %288 = arith.maximumf %286, %287 : vector<1x64xf32>
    %c0_206 = arith.constant 0 : index
    %c1_207 = arith.constant 1 : index
    %c0_208 = arith.constant 0 : index
    %289 = vector.load %arg13[%c0_206, %c1_207, %c0_208] : memref<4x2x64xf32, #tpu.memory_space<vmem>>, vector<1x1x64xf32>
    %290 = vector.shape_cast %289 : vector<1x1x64xf32> to vector<1x64xf32>
    %291 = vector.shape_cast %288 : vector<1x64xf32> to vector<1x1x64xf32>
    tpu.vector_store %arg13[%c0_206, %c1_207, %c0_208], %291 {strides = array<i32>} : memref<4x2x64xf32, #tpu.memory_space<vmem>>, vector<1x1x64xf32>,
    %292 = vector.extract_strided_slice %285 {offsets = [2, 0], sizes = [1, 64], strides = [1, 1]} : vector<8x64xf32> to vector<1x64xf32>
    %293 = vector.extract_strided_slice %285 {offsets = [3, 0], sizes = [1, 64], strides = [1, 1]} : vector<8x64xf32> to vector<1x64xf32>
    %294 = arith.maximumf %292, %293 : vector<1x64xf32>
    %c1_209 = arith.constant 1 : index
    %c1_210 = arith.constant 1 : index
    %c0_211 = arith.constant 0 : index
    %295 = vector.load %arg13[%c1_209, %c1_210, %c0_211] : memref<4x2x64xf32, #tpu.memory_space<vmem>>, vector<1x1x64xf32>
    %296 = vector.shape_cast %295 : vector<1x1x64xf32> to vector<1x64xf32>
    %297 = vector.shape_cast %294 : vector<1x64xf32> to vector<1x1x64xf32>
    tpu.vector_store %arg13[%c1_209, %c1_210, %c0_211], %297 {strides = array<i32>} : memref<4x2x64xf32, #tpu.memory_space<vmem>>, vector<1x1x64xf32>,
    %298 = vector.extract_strided_slice %285 {offsets = [4, 0], sizes = [1, 64], strides = [1, 1]} : vector<8x64xf32> to vector<1x64xf32>
    %299 = vector.extract_strided_slice %285 {offsets = [5, 0], sizes = [1, 64], strides = [1, 1]} : vector<8x64xf32> to vector<1x64xf32>
    %300 = arith.maximumf %298, %299 : vector<1x64xf32>
    %c2_212 = arith.constant 2 : index
    %c1_213 = arith.constant 1 : index
    %c0_214 = arith.constant 0 : index
    %301 = vector.load %arg13[%c2_212, %c1_213, %c0_214] : memref<4x2x64xf32, #tpu.memory_space<vmem>>, vector<1x1x64xf32>
    %302 = vector.shape_cast %301 : vector<1x1x64xf32> to vector<1x64xf32>
    %303 = vector.shape_cast %300 : vector<1x64xf32> to vector<1x1x64xf32>
    tpu.vector_store %arg13[%c2_212, %c1_213, %c0_214], %303 {strides = array<i32>} : memref<4x2x64xf32, #tpu.memory_space<vmem>>, vector<1x1x64xf32>,
    %304 = vector.extract_strided_slice %285 {offsets = [6, 0], sizes = [1, 64], strides = [1, 1]} : vector<8x64xf32> to vector<1x64xf32>
    %305 = vector.extract_strided_slice %285 {offsets = [7, 0], sizes = [1, 64], strides = [1, 1]} : vector<8x64xf32> to vector<1x64xf32>
    %306 = arith.maximumf %304, %305 : vector<1x64xf32>
    %c3_215 = arith.constant 3 : index
    %c1_216 = arith.constant 1 : index
    %c0_217 = arith.constant 0 : index
    %307 = vector.load %arg13[%c3_215, %c1_216, %c0_217] : memref<4x2x64xf32, #tpu.memory_space<vmem>>, vector<1x1x64xf32>
    %308 = vector.shape_cast %307 : vector<1x1x64xf32> to vector<1x64xf32>
    %309 = vector.shape_cast %306 : vector<1x64xf32> to vector<1x1x64xf32>
    tpu.vector_store %arg13[%c3_215, %c1_216, %c0_217], %309 {strides = array<i32>} : memref<4x2x64xf32, #tpu.memory_space<vmem>>, vector<1x1x64xf32>,
    %cst_218 = arith.constant 0.000000e+00 : f32
    %310 = vector.broadcast %cst_218 : f32 to vector<2x64xf32>
    %c0_219 = arith.constant 0 : index
    %c0_220 = arith.constant 0 : index
    %c0_221 = arith.constant 0 : index
    %311 = vector.load %arg13[%c0_219, %c0_220, %c0_221] : memref<4x2x64xf32, #tpu.memory_space<vmem>>, vector<1x2x64xf32>
    %312 = vector.shape_cast %311 : vector<1x2x64xf32> to vector<2x64xf32>
    %313 = arith.truncf %312 : vector<2x64xf32> to vector<2x64xbf16>
    %c0_222 = arith.constant 0 : index
    %c0_223 = arith.constant 0 : index
    %314 = vector.load %arg5[%c0_222, %c0_223] : memref<256x64xbf16, #tpu.memory_space<vmem>>, vector<64x64xbf16>
    %cst_224 = arith.constant dense<0.000000e+00> : vector<2x64xf32>
    %315 = tpu.matmul %313, %314, %cst_224 {dimension_numbers = #tpu.dot_dimension_numbers<[1], [0], [0], [1], [0, 0, 1, 1], [], []>} : vector<2x64xbf16>, vector<64x64xbf16>, vector<2x64xf32> -> vector<2x64xf32>
    %316 = arith.addf %310, %315 : vector<2x64xf32>
    %c1_225 = arith.constant 1 : index
    %c0_226 = arith.constant 0 : index
    %c0_227 = arith.constant 0 : index
    %317 = vector.load %arg13[%c1_225, %c0_226, %c0_227] : memref<4x2x64xf32, #tpu.memory_space<vmem>>, vector<1x2x64xf32>
    %318 = vector.shape_cast %317 : vector<1x2x64xf32> to vector<2x64xf32>
    %319 = arith.truncf %318 : vector<2x64xf32> to vector<2x64xbf16>
    %c64 = arith.constant 64 : index
    %c0_228 = arith.constant 0 : index
    %320 = vector.load %arg5[%c64, %c0_228] : memref<256x64xbf16, #tpu.memory_space<vmem>>, vector<64x64xbf16>
    %cst_229 = arith.constant dense<0.000000e+00> : vector<2x64xf32>
    %321 = tpu.matmul %319, %320, %cst_229 {dimension_numbers = #tpu.dot_dimension_numbers<[1], [0], [0], [1], [0, 0, 1, 1], [], []>} : vector<2x64xbf16>, vector<64x64xbf16>, vector<2x64xf32> -> vector<2x64xf32>
    %322 = arith.addf %316, %321 : vector<2x64xf32>
    %c2_230 = arith.constant 2 : index
    %c0_231 = arith.constant 0 : index
    %c0_232 = arith.constant 0 : index
    %323 = vector.load %arg13[%c2_230, %c0_231, %c0_232] : memref<4x2x64xf32, #tpu.memory_space<vmem>>, vector<1x2x64xf32>
    %324 = vector.shape_cast %323 : vector<1x2x64xf32> to vector<2x64xf32>
    %325 = arith.truncf %324 : vector<2x64xf32> to vector<2x64xbf16>
    %c128 = arith.constant 128 : index
    %c0_233 = arith.constant 0 : index
    %326 = vector.load %arg5[%c128, %c0_233] : memref<256x64xbf16, #tpu.memory_space<vmem>>, vector<64x64xbf16>
    %cst_234 = arith.constant dense<0.000000e+00> : vector<2x64xf32>
    %327 = tpu.matmul %325, %326, %cst_234 {dimension_numbers = #tpu.dot_dimension_numbers<[1], [0], [0], [1], [0, 0, 1, 1], [], []>} : vector<2x64xbf16>, vector<64x64xbf16>, vector<2x64xf32> -> vector<2x64xf32>
    %328 = arith.addf %322, %327 : vector<2x64xf32>
    %c3_235 = arith.constant 3 : index
    %c0_236 = arith.constant 0 : index
    %c0_237 = arith.constant 0 : index
    %329 = vector.load %arg13[%c3_235, %c0_236, %c0_237] : memref<4x2x64xf32, #tpu.memory_space<vmem>>, vector<1x2x64xf32>
    %330 = vector.shape_cast %329 : vector<1x2x64xf32> to vector<2x64xf32>
    %331 = arith.truncf %330 : vector<2x64xf32> to vector<2x64xbf16>
    %c192 = arith.constant 192 : index
    %c0_238 = arith.constant 0 : index
    %332 = vector.load %arg5[%c192, %c0_238] : memref<256x64xbf16, #tpu.memory_space<vmem>>, vector<64x64xbf16>
    %cst_239 = arith.constant dense<0.000000e+00> : vector<2x64xf32>
    %333 = tpu.matmul %331, %332, %cst_239 {dimension_numbers = #tpu.dot_dimension_numbers<[1], [0], [0], [1], [0, 0, 1, 1], [], []>} : vector<2x64xbf16>, vector<64x64xbf16>, vector<2x64xf32> -> vector<2x64xf32>
    %334 = arith.addf %328, %333 : vector<2x64xf32>
    %c0_240 = arith.constant 0 : index
    %c0_241 = arith.constant 0 : index
    %335 = vector.load %arg6[%c0_240, %c0_241] : memref<1x64xf32, #tpu.memory_space<vmem>>, vector<1x64xf32>
    %336 = vector.broadcast %335 : vector<1x64xf32> to vector<2x64xf32>
    %337 = arith.addf %334, %336 : vector<2x64xf32>
    %cst_242 = arith.constant 0.000000e+00 : f32
    %338 = vector.broadcast %cst_242 : f32 to vector<2x64xf32>
    %339 = arith.maximumf %337, %338 : vector<2x64xf32>
    %340 = arith.truncf %339 : vector<2x64xf32> to vector<2x64xbf16>
    %c0_243 = arith.constant 0 : index
    %c0_244 = arith.constant 0 : index
    %341 = vector.load %arg7[%c0_243, %c0_244] : memref<64x32xbf16, #tpu.memory_space<vmem>>, vector<64x32xbf16>
    %cst_245 = arith.constant dense<0.000000e+00> : vector<2x32xf32>
    %342 = tpu.matmul %340, %341, %cst_245 {dimension_numbers = #tpu.dot_dimension_numbers<[1], [0], [0], [1], [0, 0, 1, 1], [], []>} : vector<2x64xbf16>, vector<64x32xbf16>, vector<2x32xf32> -> vector<2x32xf32>
    %c0_246 = arith.constant 0 : index
    %c0_247 = arith.constant 0 : index
    %343 = vector.load %arg8[%c0_246, %c0_247] : memref<1x32xf32, #tpu.memory_space<vmem>>, vector<1x32xf32>
    %344 = vector.broadcast %343 : vector<1x32xf32> to vector<2x32xf32>
    %345 = arith.addf %342, %344 : vector<2x32xf32>
    %cst_248 = arith.constant 0.000000e+00 : f32
    %346 = vector.broadcast %cst_248 : f32 to vector<2x32xf32>
    %347 = arith.maximumf %345, %346 : vector<2x32xf32>
    %348 = arith.truncf %347 : vector<2x32xf32> to vector<2x32xbf16>
    %c0_249 = arith.constant 0 : index
    %c0_250 = arith.constant 0 : index
    %349 = vector.load %arg9[%c0_249, %c0_250] : memref<32x11xbf16, #tpu.memory_space<vmem>>, vector<32x11xbf16>
    %cst_251 = arith.constant dense<0.000000e+00> : vector<2x11xf32>
    %350 = tpu.matmul %348, %349, %cst_251 {dimension_numbers = #tpu.dot_dimension_numbers<[1], [0], [0], [1], [0, 0, 1, 1], [], []>} : vector<2x32xbf16>, vector<32x11xbf16>, vector<2x11xf32> -> vector<2x11xf32>
    %c0_252 = arith.constant 0 : index
    %c0_253 = arith.constant 0 : index
    %351 = vector.load %arg10[%c0_252, %c0_253] : memref<1x11xf32, #tpu.memory_space<vmem>>, vector<1x11xf32>
    %352 = vector.broadcast %351 : vector<1x11xf32> to vector<2x11xf32>
    %353 = arith.addf %350, %352 : vector<2x11xf32>
    %c0_254 = arith.constant 0 : index
    %c0_255 = arith.constant 0 : index
    %354 = vector.load %arg11[%c0_254, %c0_255] : memref<2x11xf32, #tpu.memory_space<vmem>>, vector<2x11xf32>
    tpu.vector_store %arg11[%c0_254, %c0_255], %353 {strides = array<i32>} : memref<2x11xf32, #tpu.memory_space<vmem>>, vector<2x11xf32>,
    return
  }
}

</mosaic_0001>

<bundles_post_ra>
// kernel: inos_forward.1
= control target key start
LH: loop header
LB: loop body
LE: loop exit
PB: predicated region body
PF: predicated region fallthrough
CT: control target
= control target key end

     0   :  { %v3223_v0 = vmov 0.0   ;;  %vm3224_vm0 = vmmov 0   ;;  %vm89_vm1 = vcmask 392192   ;;  %vm39_vm2 = vcmask 523264   ;;  %s3888_s1 = inlined_call_operand.vmem [shape: bf16[6,48,64], index: 1, kind: input, shape index: {}]   ;;  %s3889_s0 = inlined_call_operand.vmem [shape: f32[2,18,48], index: 0, kind: input, shape index: {}]   ;;  %s3890_s3 = inlined_call_operand.vmem [shape: bf16[6,64,64], index: 3, kind: input, shape index: {}]   ;;  %s3891_s2 = inlined_call_operand.vmem [shape: f32[1,64], index: 2, kind: input, shape index: {}]   ;;  %s3892_s5 = inlined_call_operand.vmem [shape: bf16[256,64], index: 5, kind: input, shape index: {}]   ;;  %s3893_s4 = inlined_call_operand.vmem [shape: f32[1,64], index: 4, kind: input, shape index: {}]   ;;  %s3894_s7 = inlined_call_operand.vmem [shape: bf16[64,32], index: 7, kind: input, shape index: {}]   ;;  %s3895_s9 = inlined_call_operand.vmem [shape: bf16[32,11], index: 9, kind: input, shape index: {}]   ;;  %s3896_s6 = inlined_call_operand.vmem [shape: f32[1,64], index: 6, kind: input, shape index: {}]   ;;  %s3897_s8 = inlined_call_operand.vmem [shape: f32[1,32], index: 8, kind: input, shape index: {}]   ;;  %s3898_s10 = inlined_call_operand.vmem [shape: f32[1,11], index: 10, kind: input, shape index: {}]   ;;  %s3899_s11 = inlined_call_operand.vmem [shape: f32[2,11], index: 11, kind: output, shape index: {}]  }
   0x1   :  { %2783 = vmatprep.subr.bf16.mxu0 %v3223_v0  ;;  %2793 = vmatprep.subr.bf16.mxu1 %v3223_v0  ;;  %v3117_v1 = vld [vmem:[%s3888_s1 + $0x40] sm:$0xff]   ;;  %v3118_v2 = vld [vmem:[%s3888_s1 + $0x10] sm:$0xff]   ;;  %v3119_v3 = vld [vmem:[%s3888_s1 + $0x38] sm:$0xff]   ;;  %40 = vst.msk [vmem:[#allocation2] sm:$0xff] %vm39_vm2, %v3223_v0  ;;  %vm41_vm3 = vcmask 517120   ;;  %vm480_vm4 = vcmask 516096  }
   0x2   :  { %2789 = vmatprep.mubr.msk.bf16.mxu0 %vm3224_vm0, %v3223_v0  ;;  %2799 = vmatprep.mubr.msk.bf16.mxu1 %vm3224_vm0, %v3223_v0  ;;  %v3120_v4 = vld [vmem:[%s3888_s1 + $0x8] sm:$0xff]   ;;  %v3121_v5 = vld [vmem:[%s3888_s1 + $0x30] sm:$0xff]   ;;  %v3122_v6 = vld [vmem:[%s3888_s1] sm:$0xff]   ;;  %43 = vst.msk [vmem:[#allocation2 + $0x10] sm:$0xff] %vm39_vm2, %v3223_v0  ;;  %vm482_vm5 = vcmask 518146   ;;  %vm484_vm6 = vcmask 520196  }
   0x3   :  { %2784 = vmatpush3.bf16.msra.mxu0 %v3117_v1  ;;  %2794 = vmatpush3.bf16.msra.mxu1 %v3118_v2  ;;  %v61_v7 = vld [vmem:[%s3889_s0 + $0x1] sm:$0xff]  ;;  %v62_v8 = vld [vmem:[%s3889_s0 + $0x9] sm:$0xff]  ;;  %v3123_v13 = vld [vmem:[%s3888_s1 + $0x58] sm:$0xff]   ;;  %42 = vst.msk [vmem:[#allocation2 + $0x8] sm:$0x3] %vm41_vm3, %v3223_v0  ;;  %vm486_vm7 = vcmask 522246  }
   0x4   :  { %2785 = vmatprep.subr.bf16.mxu0 %v3223_v0  ;;  %2795 = vmatprep.subr.bf16.mxu1 %v3223_v0  ;;  %v45_v9 = vld [vmem:[%s3889_s0] sm:$0xff]  ;;  %v46_v10 = vld [vmem:[%s3889_s0 + $0x8] sm:$0xff]  ;;  %v63_v11 = vpack.c.bf16 %v62_v8, %v61_v7  ;;  %v3125_v15 = vld [vmem:[%s3888_s1 + $0x50] sm:$0xff]   ;;  %44 = vst.msk [vmem:[#allocation2 + $0x18] sm:$0x3] %vm41_vm3, %v3223_v0  ;;  %vm2308_vm8 = vcmask 261120  }
   0x5   :  { %v47_v12 = vpack.c.bf16 %v46_v10, %v45_v9  ;;  %v3124_v14 = vld [vmem:[%s3888_s1 + $0x28] sm:$0xff]   ;;  %v3126_v16 = vld [vmem:[%s3888_s1 + $0x20] sm:$0xff]   ;;  %v3128_v18 = vld [vmem:[%s3888_s1 + $0x18] sm:$0xff]   ;;  %vm2352_vm9 = vcmask 82944  }
   0x6   :  { %v3127_v17 = vld [vmem:[%s3888_s1 + $0x48] sm:$0xff]   ;;  %v3129_v19 = vld [vmem:[%s3888_s1 + $0x70] sm:$0xff]   ;;  %v3132_v22 = vld [vmem:[%s3888_s1 + $0x80] sm:$0xff]  }
   0x7   :  { %2786 = vmatpush3.bf16.msra.mxu0 %v3119_v3  ;;  %2796 = vmatpush3.bf16.msra.mxu1 %v3120_v4  ;;  %v3130_v20 = vld [vmem:[%s3888_s1 + $0x88] sm:$0xff]   ;;  %v3133_v23 = vld [vmem:[%s3888_s1 + $0x60] sm:$0xff]   ;;  %v3134_v26 = vld [vmem:[%s3888_s1 + $0x78] sm:$0xff]  }
   0x8   :  { %2787 = vmatprep.subr.bf16.mxu0 %v3223_v0  ;;  %2797 = vmatprep.subr.bf16.mxu1 %v3223_v0  ;;  %v3131_v21 = vld [vmem:[%s3888_s1 + $0x68] sm:$0xff]   ;;  %v3135_v28 = vld [vmem:[%s3888_s1 + $0x40] sm:$0xff]   ;;  %v3136_v29 = vld [vmem:[%s3888_s1 + $0x10] sm:$0xff]  }
   0x9   :  { %v321_v24 = vld [vmem:[%s3889_s0 + $0x2] sm:$0xff]  ;;  %v322_v25 = vld [vmem:[%s3889_s0 + $0xa] sm:$0xff]  ;;  %v3137_v30 = vld [vmem:[%s3888_s1 + $0x38] sm:$0xff]  }
   0xa   :  { %v323_v27 = vpack.c.bf16 %v322_v25, %v321_v24  ;;  %v3138_v31 = vld [vmem:[%s3888_s1 + $0x8] sm:$0xff]   ;;  %v3139_v32 = vld [vmem:[%s3888_s1 + $0x30] sm:$0xff]   ;;  %v2421_v33 = vld [vmem:[%s3889_s0 + $0x19] sm:$0xff] }
   0xb   :  { %2788 = vmatpush3.bf16.msra.mxu0 %v3121_v5  ;;  %2798 = vmatpush3.bf16.msra.mxu1 %v3122_v6  ;;  %v2422_v34 = vld [vmem:[%s3889_s0 + $0x21] sm:$0xff]  ;;  %v2413_v36 = vld [vmem:[%s3889_s0 + $0x18] sm:$0xff]  ;;  %v3143_v42 = vld [vmem:[%s3888_s1 + $0x50] sm:$0xff]  }
   0xc   :  { %2803 = vmatprep.subr.bf16.mxu0 %v3223_v0  ;;  %2813 = vmatprep.subr.bf16.mxu1 %v3223_v0  ;;  %v3140_v35 = vld [vmem:[%s3888_s1] sm:$0xff]   ;;  %v514_v38 = vpack.c.bf16 %v2422_v34, %v2421_v33  ;;  %v3141_v40 = vld [vmem:[%s3888_s1 + $0x58] sm:$0xff]   ;;  %v3142_v41 = vld [vmem:[%s3888_s1 + $0x28] sm:$0xff]  }
   0xd   :  { %v2414_v37 = vld [vmem:[%s3889_s0 + $0x20] sm:$0xff]  ;;  %v3145_v44 = vld [vmem:[%s3888_s1 + $0x48] sm:$0xff]   ;;  %v3146_v45 = vld [vmem:[%s3888_s1 + $0x18] sm:$0xff]  }
   0xe   :  { %2790 = vmatmul.mubr.msk.bf16.vlgmr.msra.gmra.mxu0 %vm89_vm1, %v63_v11  ;;  %2800 = vmatmul.mubr.msk.bf16.vlgmr.msra.gmra.mxu1 %vm89_vm1, %v47_v12  ;;  %v499_v39 = vpack.c.bf16 %v2414_v37, %v2413_v36  ;;  %v3144_v43 = vld [vmem:[%s3888_s1 + $0x20] sm:$0xff]   ;;  %v3147_v46 = vld [vmem:[%s3888_s1 + $0x70] sm:$0xff]   ;;  %v3148_v47 = vld [vmem:[%s3888_s1 + $0x88] sm:$0xff]  }
   0xf   :  { %2804 = vmatpush3.bf16.msra.mxu0 %v3123_v13  ;;  %2814 = vmatpush3.bf16.msra.mxu1 %v3124_v14  ;;  %v3149_v48 = vld [vmem:[%s3888_s1 + $0x68] sm:$0xff]   ;;  %v3150_v49 = vld [vmem:[%s3888_s1 + $0x80] sm:$0xff]   ;;  %v3152_v53 = vld [vmem:[%s3888_s1 + $0x78] sm:$0xff]  }
  0x10   :  { %2805 = vmatprep.subr.bf16.mxu0 %v3223_v0  ;;  %2815 = vmatprep.subr.bf16.mxu1 %v3223_v0  ;;  %v3151_v50 = vld [vmem:[%s3888_s1 + $0x60] sm:$0xff]   ;;  %v3153_v55 = vld [vmem:[%s3890_s3 + $0x58] sm:$0xff]   ;;  %v3155_v57 = vld [vmem:[%s3890_s3 + $0x50] sm:$0xff]  }
  0x11   :  { %2809 = vmatprep.mubr.msk.bf16.mxu0 %vm3224_vm0, %v3223_v0  ;;  %2819 = vmatprep.mubr.msk.bf16.mxu1 %vm3224_vm0, %v3223_v0  ;;  %v2451_v51 = vld [vmem:[%s3889_s0 + $0x1a] sm:$0xff]  ;;  %v2452_v52 = vld [vmem:[%s3889_s0 + $0x22] sm:$0xff]  ;;  %v3156_v58 = vld [vmem:[%s3890_s3 + $0x10] sm:$0xff]  }
  0x12   :  { %v771_v54 = vpack.c.bf16 %v2452_v52, %v2451_v51  ;;  %v3154_v56 = vld [vmem:[%s3890_s3 + $0x18] sm:$0xff]   ;;  %v3157_v59 = vld [vmem:[%s3890_s3 + $0x48] sm:$0xff]   ;;  %v3159_v61 = vld [vmem:[%s3890_s3 + $0x40] sm:$0xff]  }
  0x13   :  { %2806 = vmatpush3.bf16.msra.mxu0 %v3125_v15  ;;  %2816 = vmatpush3.bf16.msra.mxu1 %v3126_v16  ;;  %v3158_v60 = vld [vmem:[%s3890_s3 + $0x8] sm:$0xff]   ;;  %v3160_v62 = vld [vmem:[%s3890_s3] sm:$0xff]   ;;  %v3161_v51 = vld [vmem:[%s3890_s3 + $0x78] sm:$0xff]  }
  0x14   :  { %2807 = vmatprep.subr.bf16.mxu0 %v3223_v0  ;;  %2817 = vmatprep.subr.bf16.mxu1 %v3223_v0  ;;  %v3548_v24 = vld [vmem:[%s3891_s2] ss:$0 sm:$0xff] }
  0x17   :  { %2808 = vmatpush3.bf16.msra.mxu0 %v3127_v17  ;;  %2818 = vmatpush3.bf16.msra.mxu1 %v3128_v18 }
  0x18   :  { %2823 = vmatprep.subr.bf16.mxu0 %v3223_v0  ;;  %2833 = vmatprep.subr.bf16.mxu1 %v3223_v0 }
  0x1a   :  { %2810 = vmatmul.mubr.msk.bf16.vlgmr.msra.gmra.mxu0 %vm89_vm1, %v63_v11  ;;  %2820 = vmatmul.mubr.msk.bf16.vlgmr.msra.gmra.mxu1 %vm89_vm1, %v47_v12 }
  0x1b   :  { %2824 = vmatpush3.bf16.msra.mxu0 %v3129_v19  ;;  %2834 = vmatpush3.bf16.msra.mxu1 %v3130_v20 }
  0x1c   :  { %2825 = vmatprep.subr.bf16.mxu0 %v3223_v0  ;;  %2835 = vmatprep.subr.bf16.mxu1 %v3223_v0 }
  0x1d   :  { %2829 = vmatprep.mubr.msk.bf16.mxu0 %vm3224_vm0, %v3223_v0  ;;  %2839 = vmatprep.mubr.msk.bf16.mxu1 %vm3224_vm0, %v3223_v0 }
  0x1f   :  { %2826 = vmatpush3.bf16.msra.mxu0 %v3131_v21  ;;  %2836 = vmatpush3.bf16.msra.mxu1 %v3132_v22 }
  0x20   :  { %2827 = vmatprep.subr.bf16.mxu0 %v3223_v0  ;;  %2837 = vmatprep.subr.bf16.mxu1 %v3223_v0 }
  0x23   :  { %2828 = vmatpush3.bf16.msra.mxu0 %v3133_v23  ;;  %2838 = vmatpush3.bf16.msra.mxu1 %v3134_v26 }
  0x24   :  { %2843 = vmatprep.subr.bf16.mxu0 %v3223_v0  ;;  %2853 = vmatprep.subr.bf16.mxu1 %v3223_v0 }
  0x26   :  { %2830 = vmatmul.mubr.msk.bf16.vlgmr.msra.gmra.mxu0 %vm89_vm1, %v323_v27  ;;  %2840 = vmatmul.mubr.msk.bf16.vlgmr.msra.gmra.mxu1 %vm89_vm1, %v323_v27 }
  0x27   :  { %2844 = vmatpush3.bf16.msra.mxu0 %v3135_v28  ;;  %2854 = vmatpush3.bf16.msra.mxu1 %v3136_v29 }
  0x28   :  { %2845 = vmatprep.subr.bf16.mxu0 %v3223_v0  ;;  %2855 = vmatprep.subr.bf16.mxu1 %v3223_v0 }
  0x29   :  { %2849 = vmatprep.mubr.msk.bf16.mxu0 %vm3224_vm0, %v3223_v0  ;;  %2859 = vmatprep.mubr.msk.bf16.mxu1 %vm3224_vm0, %v3223_v0 }
  0x2b   :  { %2846 = vmatpush3.bf16.msra.mxu0 %v3137_v30  ;;  %2856 = vmatpush3.bf16.msra.mxu1 %v3138_v31 }
  0x2c   :  { %2847 = vmatprep.subr.bf16.mxu0 %v3223_v0  ;;  %2857 = vmatprep.subr.bf16.mxu1 %v3223_v0 }
  0x2f   :  { %2848 = vmatpush3.bf16.msra.mxu0 %v3139_v32  ;;  %2858 = vmatpush3.bf16.msra.mxu1 %v3140_v35 }
  0x30   :  { %2863 = vmatprep.subr.bf16.mxu0 %v3223_v0  ;;  %2873 = vmatprep.subr.bf16.mxu1 %v3223_v0 }
  0x32   :  { %2850 = vmatmul.mubr.msk.bf16.vlgmr.msra.gmra.mxu0 %vm89_vm1, %v514_v38  ;;  %2860 = vmatmul.mubr.msk.bf16.vlgmr.msra.gmra.mxu1 %vm89_vm1, %v499_v39 }
  0x33   :  { %2864 = vmatpush3.bf16.msra.mxu0 %v3141_v40  ;;  %2874 = vmatpush3.bf16.msra.mxu1 %v3142_v41 }
  0x34   :  { %2865 = vmatprep.subr.bf16.mxu0 %v3223_v0  ;;  %2875 = vmatprep.subr.bf16.mxu1 %v3223_v0 }
  0x35   :  { %2869 = vmatprep.mubr.msk.bf16.mxu0 %vm3224_vm0, %v3223_v0  ;;  %2879 = vmatprep.mubr.msk.bf16.mxu1 %vm3224_vm0, %v3223_v0 }
  0x37   :  { %2866 = vmatpush3.bf16.msra.mxu0 %v3143_v42  ;;  %2876 = vmatpush3.bf16.msra.mxu1 %v3144_v43 }
  0x38   :  { %2867 = vmatprep.subr.bf16.mxu0 %v3223_v0  ;;  %2877 = vmatprep.subr.bf16.mxu1 %v3223_v0 }
  0x3b   :  { %2868 = vmatpush3.bf16.msra.mxu0 %v3145_v44  ;;  %2878 = vmatpush3.bf16.msra.mxu1 %v3146_v45 }
  0x3c   :  { %2883 = vmatprep.subr.bf16.mxu0 %v3223_v0  ;;  %2893 = vmatprep.subr.bf16.mxu1 %v3223_v0 }
  0x3e   :  { %2870 = vmatmul.mubr.msk.bf16.vlgmr.msra.gmra.mxu0 %vm89_vm1, %v514_v38  ;;  %2880 = vmatmul.mubr.msk.bf16.vlgmr.msra.gmra.mxu1 %vm89_vm1, %v499_v39 }
  0x3f   :  { %2884 = vmatpush3.bf16.msra.mxu0 %v3147_v46  ;;  %2894 = vmatpush3.bf16.msra.mxu1 %v3148_v47 }
  0x40   :  { %2885 = vmatprep.subr.bf16.mxu0 %v3223_v0  ;;  %2895 = vmatprep.subr.bf16.mxu1 %v3223_v0 }
  0x41   :  { %2889 = vmatprep.mubr.msk.bf16.mxu0 %vm3224_vm0, %v3223_v0  ;;  %2899 = vmatprep.mubr.msk.bf16.mxu1 %vm3224_vm0, %v3223_v0 }
  0x43   :  { %2886 = vmatpush3.bf16.msra.mxu0 %v3149_v48  ;;  %2896 = vmatpush3.bf16.msra.mxu1 %v3150_v49 }
  0x44   :  { %2887 = vmatprep.subr.bf16.mxu0 %v3223_v0  ;;  %2897 = vmatprep.subr.bf16.mxu1 %v3223_v0 }
  0x47   :  { %2888 = vmatpush3.bf16.msra.mxu0 %v3151_v50  ;;  %2898 = vmatpush3.bf16.msra.mxu1 %v3152_v53 }
  0x48   :  { %2903 = vmatprep.subr.bf16.mxu0 %v3223_v0  ;;  %2915 = vmatprep.subr.bf16.mxu1 %v3223_v0 }
  0x4a   :  { %2890 = vmatmul.mubr.msk.bf16.vlgmr.msra.gmra.mxu0 %vm89_vm1, %v771_v54  ;;  %2900 = vmatmul.mubr.msk.bf16.vlgmr.msra.gmra.mxu1 %vm89_vm1, %v771_v54 }
  0x4b   :  { %2911 = vmatprep.mubr.msk.bf16.mxu0 %vm3224_vm0, %v3223_v0  ;;  %2923 = vmatprep.mubr.msk.bf16.mxu1 %vm3224_vm0, %v3223_v0 }
  0x4c   :  { %2904 = vmatpush3.bf16.msra.mxu0 %v3153_v55  ;;  %2916 = vmatpush3.bf16.msra.mxu1 %v3154_v56  ;;  %v3162_v55 = vld [vmem:[%s3890_s3 + $0x38] sm:$0xff]  }
  0x4d   :  { %2905 = vmatprep.subr.bf16.mxu0 %v3223_v0  ;;  %2917 = vmatprep.subr.bf16.mxu1 %v3223_v0 }
  0x50   :  { %2906 = vmatpush3.bf16.msra.mxu0 %v3155_v57  ;;  %2918 = vmatpush3.bf16.msra.mxu1 %v3156_v58 }
  0x51   :  { %2907 = vmatprep.subr.bf16.mxu0 %v3223_v0  ;;  %2919 = vmatprep.subr.bf16.mxu1 %v3223_v0 }
  0x54   :  { %2908 = vmatpush3.bf16.msra.mxu0 %v3157_v59  ;;  %2920 = vmatpush3.bf16.msra.mxu1 %v3158_v60 }
  0x55   :  { %2909 = vmatprep.subr.bf16.mxu0 %v3223_v0  ;;  %2921 = vmatprep.subr.bf16.mxu1 %v3223_v0 }
  0x58   :  { %2910 = vmatpush3.bf16.msra.mxu0 %v3159_v61  ;;  %2922 = vmatpush3.bf16.msra.mxu1 %v3160_v62  ;;  %v3163_v62 = vld [vmem:[%s3890_s3 + $0x70] sm:$0xff]  }
  0x59   :  { %2927 = vmatprep.subr.bf16.mxu0 %v3223_v0  ;;  %2939 = vmatprep.subr.bf16.mxu1 %v3223_v0 }
  0xce   :  { %v127_v63 = vpop.f32.mrf.mxu0  ;;  %v189_v1 = vpop.f32.mrf.mxu1 }
  0xcf   :  { %v190_v16 = vadd.f32 %v189_v1, %v127_v63  ;;  %v3164_v63 = vld [vmem:[%s3890_s3 + $0x30] sm:$0xff]  }
  0xd0   :  { %v2791_v2 = vpop.f32.mrf.mxu0  ;;  %v2801_v3 = vpop.f32.mrf.mxu1 }
  0xd2   :  { %v130_v4 = vpop.f32.mrf.mxu0  ;;  %v192_v5 = vpop.f32.mrf.mxu1 }
  0xd3   :  { %v193_v23 = vadd.f32 %v192_v5, %v130_v4  ;;  %v3165_v4 = vld [vmem:[%s3890_s3 + $0x68] sm:$0xff]  }
  0xd4   :  { %v2792_v6 = vpop.f32.mrf.mxu0  ;;  %v2802_v7 = vpop.f32.mrf.mxu1  ;;  %v3166_v5 = vld [vmem:[%s3890_s3 + $0x28] sm:$0xff]  }
  0xda   :  { %v255_v8 = vpop.f32.mrf.mxu0  ;;  %v314_v9 = vpop.f32.mrf.mxu1 }
  0xdb   :  { %v315_v17 = vadd.f32 %v314_v9, %v255_v8 }
  0xdc   :  { %v2811_v10 = vpop.f32.mrf.mxu0  ;;  %v2821_v11 = vpop.f32.mrf.mxu1 }
  0xdd   :  { %v3167_v11 = vld [vmem:[%s3890_s3 + $0x60] sm:$0xff]  }
  0xde   :  { %v258_v12 = vpop.f32.mrf.mxu0  ;;  %v317_v13 = vpop.f32.mrf.mxu1 }
  0xdf   :  { %v318_v26 = vadd.f32 %v317_v13, %v258_v12  ;;  %v3168_v12 = vld [vmem:[%s3890_s3 + $0x20] sm:$0xff]  }
  0xe0   :  { %v2812_v14 = vpop.f32.mrf.mxu0  ;;  %v2822_v15 = vpop.f32.mrf.mxu1 }
  0xe6   :  { %v386_v18 = vpop.f32.mrf.mxu0  ;;  %v454_v20 = vpop.f32.mrf.mxu1 }
  0xe7   :  { %v393_v19 = vadd.f32 %v386_v18, %v190_v16  ;;  %v461_v21 = vadd.f32 %v454_v20, %v315_v17 }
  0xe8   :  { %v2831_v22 = vpop.f32.mrf.mxu0  ;;  %v2841_v25 = vpop.f32.mrf.mxu1 }
  0xe9   :  { %v463_v27 = vmax.f32 %v393_v19, %v461_v21  ;;  %v3169_v22 = vld [vmem:[%s3890_s3 + $0x98] sm:$0xff]  }
  0xea   :  { %v389_v28 = vpop.f32.mrf.mxu0  ;;  %v457_v30 = vpop.f32.mrf.mxu1 }
  0xeb   :  { %v394_v29 = vadd.f32 %v389_v28, %v193_v23  ;;  %v472_v31 = vadd.f32 %v3548_v24, %v463_v27  ;;  %v462_v32 = vadd.f32 %v457_v30, %v318_v26  ;;  %v3170_v23 = vld [vmem:[%s3890_s3 + $0xb8] sm:$0xff]  }
  0xec   :  { %v2832_v33 = vpop.f32.mrf.mxu0  ;;  %v2842_v34 = vpop.f32.mrf.mxu1 }
  0xed   :  { %v474_v35 = vmax.f32 %v472_v31, 0.0  ;;  %v464_v36 = vmax.f32 %v394_v29, %v462_v32  ;;  %v3171_v31 = vld [vmem:[%s3890_s3 + $0x90] sm:$0xff]  }
  0xee   :  { %v3172_v32 = vld [vmem:[%s3890_s3 + $0xb0] sm:$0xff]  }
  0xef   :  { %v477_v37 = vrot.slane %v474_v35, 1  ;;  %v473_v38 = vadd.f32 %v3548_v24, %v464_v36 }
  0xf1   :  { %v479_v39 = vmax.f32 %v474_v35, %v477_v37  ;;  %v475_v40 = vmax.f32 %v473_v38, 0.0  ;;  %v3173_v37 = vld [vmem:[%s3890_s3 + $0x88] sm:$0xff]  }
  0xf2   :  { %v576_v41 = vpop.f32.mrf.mxu0  ;;  %v638_v42 = vpop.f32.mrf.mxu1 }
  0xf3   :  { %481 = vst.msk [vmem:[#allocation2 + $0x1] sm:$0x1] %vm480_vm4, %v479_v39  ;;  %v489_v43 = vrot.slane %v475_v40, 1  ;;  %v639_v7 = vadd.f32 %v638_v42, %v576_v41  ;;  %v3176_v41 = vld [vmem:[%s3890_s3 + $0xa0] sm:$0xff]  }
  0xf4   :  { %483 = vst.msk [vmem:[#allocation2] sm:$0x4] %vm482_vm5, %v479_v39  ;;  %v2851_v44 = vpop.f32.mrf.mxu0  ;;  %v2861_v45 = vpop.f32.mrf.mxu1 }
  0xf5   :  { %485 = vst.msk [vmem:[#allocation2 - $0x1] sm:$0x10] %vm484_vm6, %v479_v39  ;;  %v491_v46 = vmax.f32 %v475_v40, %v489_v43  ;;  %v3175_v40 = vld [vmem:[%s3890_s3 + $0x80] sm:$0xff]   ;;  %v3177_v43 = vld [vmem:[%s3890_s3 + $0x58] sm:$0xff]  }
  0xf6   :  { %487 = vst.msk [vmem:[#allocation2 - $0x2] sm:$0x40] %vm486_vm7, %v479_v39  ;;  %v579_v47 = vpop.f32.mrf.mxu0  ;;  %v641_v48 = vpop.f32.mrf.mxu1  ;;  %v3178_v44 = vld [vmem:[%s3890_s3 + $0x18] sm:$0xff]  }
  0xf7   :  { %492 = vst.msk [vmem:[#allocation2 + $0x5] sm:$0x1] %vm480_vm4, %v491_v46  ;;  %v642_v16 = vadd.f32 %v641_v48, %v579_v47  ;;  %v3180_v47 = vld [vmem:[%s3890_s3 + $0x10] sm:$0xff]   ;;  %v3181_v48 = vld [vmem:[%s3890_s3 + $0x48] sm:$0xff]  }
  0xf8   :  { %493 = vst.msk [vmem:[#allocation2 + $0x4] sm:$0x4] %vm482_vm5, %v491_v46  ;;  %v2852_v49 = vpop.f32.mrf.mxu0  ;;  %v2862_v50 = vpop.f32.mrf.mxu1 }
  0xf9   :  { %494 = vst.msk [vmem:[#allocation2 + $0x3] sm:$0x10] %vm484_vm6, %v491_v46  ;;  %v3182_v49 = vld [vmem:[%s3890_s3 + $0x8] sm:$0xff]   ;;  %v3183_v50 = vld [vmem:[%s3890_s3 + $0x40] sm:$0xff]  }
  0xfa   :  { %495 = vst.msk [vmem:[#allocation2 + $0x2] sm:$0x40] %vm486_vm7, %v491_v46  ;;  %v3179_v46 = vld [vmem:[%s3890_s3 + $0x50] sm:$0xff]  }
  0xfe   :  { %v703_v52 = vpop.f32.mrf.mxu0  ;;  %v762_v56 = vpop.f32.mrf.mxu1 }
  0xff   :  { %v763_v6 = vadd.f32 %v762_v56, %v703_v52 }
 0x100   :  { %v939_v54 = vld [vmem:[#allocation2] sm:$0xff]  ;;  %v2871_v59 = vpop.f32.mrf.mxu0  ;;  %v2881_v60 = vpop.f32.mrf.mxu1 }
 0x101   :  { %v958_v53 = vld [vmem:[#allocation2 + $0x1] sm:$0xff]  ;;  %v940_v58 = vpack.c.bf16 %v939_v54, %v939_v54  ;;  %v3185_v54 = vld [vmem:[%s3890_s3 + $0x78] sm:$0xff]   ;;  %v3188_v59 = vld [vmem:[%s3890_s3 + $0x30] sm:$0xff]  }
 0x102   :  { %v959_v57 = vpack.c.bf16 %v958_v53, %v958_v53  ;;  %v706_v61 = vpop.f32.mrf.mxu0  ;;  %v765_v1 = vpop.f32.mrf.mxu1  ;;  %v1240_v42 = vld [vmem:[#allocation2 + $0x2] sm:$0xff] }
 0x103   :  { %2924 = vmatmul.mubr.msk.bf16.vlgmr.msra.gmra.mxu1 %vm39_vm2, %v940_v58  ;;  %v766_v13 = vadd.f32 %v765_v1, %v706_v61  ;;  %v1241_v45 = vpack.c.bf16 %v1240_v42, %v1240_v42  ;;  %v3189_v60 = vld [vmem:[%s3890_s3 + $0x68] sm:$0xff]   ;;  %v3193_v1 = vld [vmem:[%s3890_s3 + $0x98] sm:$0xff]  }
 0x104   :  { %2912 = vmatmul.mubr.msk.bf16.vlgmr.msra.gmra.mxu0 %vm39_vm2, %v959_v57  ;;  %2940 = vmatpush3.bf16.msra.mxu1 %v3162_v55  ;;  %v2872_v2 = vpop.f32.mrf.mxu0  ;;  %v2882_v3 = vpop.f32.mrf.mxu1  ;;  %v3186_v55 = vld [vmem:[%s3890_s3 + $0x38] sm:$0xff]   ;;  %v3190_v61 = vld [vmem:[%s3890_s3 + $0x28] sm:$0xff]  }
 0x105   :  { %2928 = vmatpush3.bf16.msra.mxu0 %v3161_v51  ;;  %2941 = vmatprep.subr.bf16.mxu1 %v3223_v0  ;;  %v3184_v51 = vld [vmem:[%s3890_s3] sm:$0xff]   ;;  %v3194_v2 = vld [vmem:[%s3890_s3 + $0xb8] sm:$0xff]   ;;  %v3195_v3 = vld [vmem:[%s3890_s3 + $0x90] sm:$0xff]  }
 0x106   :  { %2929 = vmatprep.subr.bf16.mxu0 %v3223_v0  ;;  %2935 = vmatprep.mubr.msk.bf16.mxu0 %vm3224_vm0, %v3223_v0 }
 0x107   :  { %2947 = vmatprep.mubr.msk.bf16.mxu1 %vm3224_vm0, %v3223_v0 }
 0x108   :  { %2942 = vmatpush3.bf16.msra.mxu1 %v3164_v63  ;;  %v3192_v63 = vld [vmem:[%s3890_s3 + $0x20] sm:$0xff]  }
 0x109   :  { %2930 = vmatpush3.bf16.msra.mxu0 %v3163_v62  ;;  %2943 = vmatprep.subr.bf16.mxu1 %v3223_v0  ;;  %v3191_v62 = vld [vmem:[%s3890_s3 + $0x60] sm:$0xff]  }
 0x10a   :  { %2931 = vmatprep.subr.bf16.mxu0 %v3223_v0  ;;  %v833_v8 = vpop.f32.mrf.mxu0  ;;  %v900_v10 = vpop.f32.mrf.mxu1 }
 0x10b   :  { %v840_v9 = vadd.f32 %v833_v8, %v639_v7  ;;  %v907_v14 = vadd.f32 %v900_v10, %v763_v6  ;;  %v3198_v6 = vld [vmem:[%s3890_s3 + $0xa8] sm:$0xff]   ;;  %v3199_v7 = vld [vmem:[%s3890_s3 + $0x80] sm:$0xff]  }
 0x10c   :  { %2944 = vmatpush3.bf16.msra.mxu1 %v3166_v5  ;;  %v2891_v15 = vpop.f32.mrf.mxu0  ;;  %v2901_v17 = vpop.f32.mrf.mxu1  ;;  %v3197_v5 = vld [vmem:[%s3890_s3 + $0x88] sm:$0xff]   ;;  %v3200_v8 = vld [vmem:[%s3890_s3 + $0xa0] sm:$0xff]  }
 0x10d   :  { %2932 = vmatpush3.bf16.msra.mxu0 %v3165_v4  ;;  %2945 = vmatprep.subr.bf16.mxu1 %v3223_v0  ;;  %v909_v18 = vmax.f32 %v840_v9, %v907_v14  ;;  %v3196_v4 = vld [vmem:[%s3890_s3 + $0xb0] sm:$0xff]   ;;  %v3205_v15 = vld [vmem:[%s3892_s5 + $0x28] sm:$0xff]   ;;  %v3207_v17 = vld [vmem:[%s3892_s5 + $0x20] sm:$0xff]  }
 0x10e   :  { %2933 = vmatprep.subr.bf16.mxu0 %v3223_v0  ;;  %v836_v19 = vpop.f32.mrf.mxu0  ;;  %v903_v21 = vpop.f32.mrf.mxu1  ;;  %v3204_v14 = vld [vmem:[%s3892_s5 + $0x10] sm:$0xff]  }
 0x10f   :  { %v841_v20 = vadd.f32 %v836_v19, %v642_v16  ;;  %v918_v25 = vadd.f32 %v3548_v24, %v909_v18  ;;  %v908_v26 = vadd.f32 %v903_v21, %v766_v13  ;;  %v3203_v13 = vld [vmem:[%s3892_s5 + $0x30] sm:$0xff]   ;;  %v3206_v16 = vld [vmem:[%s3892_s5 + $0x8] sm:$0xff]   ;;  %v3208_v18 = vld [vmem:[%s3892_s5] sm:$0xff]  }
 0x110   :  { %2946 = vmatpush3.bf16.msra.mxu1 %v3168_v12  ;;  %v2892_v27 = vpop.f32.mrf.mxu0  ;;  %v2902_v28 = vpop.f32.mrf.mxu1  ;;  %v3202_v12 = vld [vmem:[%s3892_s5 + $0x18] sm:$0xff]  }
 0x111   :  { %2934 = vmatpush3.bf16.msra.mxu0 %v3167_v11  ;;  %2963 = vmatprep.subr.bf16.mxu1 %v3223_v0  ;;  %v920_v29 = vmax.f32 %v918_v25, 0.0  ;;  %v910_v30 = vmax.f32 %v841_v20, %v908_v26  ;;  %v3201_v11 = vld [vmem:[%s3892_s5 + $0x38] sm:$0xff]  }
 0x112   :  { %2951 = vmatprep.subr.bf16.mxu0 %v3223_v0 }
 0x113   :  { %2948 = vmatmul.mubr.msk.bf16.vlgmr.msra.gmra.mxu1 %vm39_vm2, %v940_v58  ;;  %v923_v33 = vrot.slane %v920_v29, 1  ;;  %v919_v34 = vadd.f32 %v3548_v24, %v910_v30  ;;  %v3174_v24 = vld [vmem:[%s3890_s3 + $0xa8] sm:$0xff]   ;;  %v3187_v58 = vld [vmem:[%s3890_s3 + $0x70] sm:$0xff]  }
 0x114   :  { %2936 = vmatmul.mubr.msk.bf16.vlgmr.msra.gmra.mxu0 %vm39_vm2, %v959_v57  ;;  %2964 = vmatpush3.bf16.msra.mxu1 %v3170_v23 }
 0x115   :  { %2952 = vmatpush3.bf16.msra.mxu0 %v3169_v22  ;;  %2965 = vmatprep.subr.bf16.mxu1 %v3223_v0  ;;  %v925_v35 = vmax.f32 %v920_v29, %v923_v33  ;;  %v921_v36 = vmax.f32 %v919_v34, 0.0 }
 0x116   :  { %2953 = vmatprep.subr.bf16.mxu0 %v3223_v0  ;;  %2959 = vmatprep.mubr.msk.bf16.mxu0 %vm3224_vm0, %v3223_v0 }
 0x117   :  { %2971 = vmatprep.mubr.msk.bf16.mxu1 %vm3224_vm0, %v3223_v0  ;;  %927 = vst.msk [vmem:[#allocation2 + $0x11] sm:$0x1] %vm480_vm4, %v925_v35  ;;  %v932_v38 = vrot.slane %v921_v36, 1 }
 0x118   :  { %2966 = vmatpush3.bf16.msra.mxu1 %v3172_v32  ;;  %928 = vst.msk [vmem:[#allocation2 + $0x10] sm:$0x4] %vm482_vm5, %v925_v35 }
 0x119   :  { %2954 = vmatpush3.bf16.msra.mxu0 %v3171_v31  ;;  %929 = vst.msk [vmem:[#allocation2 + $0xf] sm:$0x10] %vm484_vm6, %v925_v35  ;;  %2967 = vmatprep.subr.bf16.mxu1 %v3223_v0  ;;  %v934_v39 = vmax.f32 %v921_v36, %v932_v38 }
 0x11a   :  { %930 = vst.msk [vmem:[#allocation2 + $0xe] sm:$0x40] %vm486_vm7, %v925_v35  ;;  %2955 = vmatprep.subr.bf16.mxu0 %v3223_v0 }
 0x11b   :  { %935 = vst.msk [vmem:[#allocation2 + $0x15] sm:$0x1] %vm480_vm4, %v934_v39 }
 0x11c   :  { %2968 = vmatpush3.bf16.msra.mxu1 %v3174_v24  ;;  %936 = vst.msk [vmem:[#allocation2 + $0x14] sm:$0x4] %vm482_vm5, %v934_v39 }
 0x11d   :  { %2956 = vmatpush3.bf16.msra.mxu0 %v3173_v37  ;;  %937 = vst.msk [vmem:[#allocation2 + $0x13] sm:$0x10] %vm484_vm6, %v934_v39  ;;  %2969 = vmatprep.subr.bf16.mxu1 %v3223_v0 }
 0x11e   :  { %938 = vst.msk [vmem:[#allocation2 + $0x12] sm:$0x40] %vm486_vm7, %v934_v39  ;;  %2957 = vmatprep.subr.bf16.mxu0 %v3223_v0 }
 0x120   :  { %2970 = vmatpush3.bf16.msra.mxu1 %v3176_v41  ;;  %v2544_v41 = vld [vmem:[%s3893_s4] ss:$0 sm:$0xff] }
 0x121   :  { %2958 = vmatpush3.bf16.msra.mxu0 %v3175_v40  ;;  %2987 = vmatprep.subr.bf16.mxu1 %v3223_v0 }
 0x122   :  { %2975 = vmatprep.subr.bf16.mxu0 %v3223_v0 }
 0x123   :  { %2972 = vmatmul.mubr.msk.bf16.vlgmr.msra.gmra.mxu1 %vm39_vm2, %v1241_v45 }
 0x124   :  { %2960 = vmatmul.mubr.msk.bf16.vlgmr.msra.gmra.mxu0 %vm39_vm2, %v1241_v45  ;;  %2988 = vmatpush3.bf16.msra.mxu1 %v3178_v44  ;;  %v1414_v53 = vld [vmem:[#allocation2 + $0x10] sm:$0xff] }
 0x125   :  { %2976 = vmatpush3.bf16.msra.mxu0 %v3177_v43  ;;  %2989 = vmatprep.subr.bf16.mxu1 %v3223_v0  ;;  %v1432_v52 = vld [vmem:[#allocation2 + $0x11] sm:$0xff]  ;;  %v1415_v57 = vpack.c.bf16 %v1414_v53, %v1414_v53 }
 0x126   :  { %2977 = vmatprep.subr.bf16.mxu0 %v3223_v0  ;;  %2983 = vmatprep.mubr.msk.bf16.mxu0 %vm3224_vm0, %v3223_v0  ;;  %v1433_v56 = vpack.c.bf16 %v1432_v52, %v1432_v52  ;;  %v1712_v9 = vld [vmem:[#allocation2 + $0x12] sm:$0xff] }
 0x127   :  { %2995 = vmatprep.mubr.msk.bf16.mxu1 %vm3224_vm0, %v3223_v0  ;;  %v1713_v10 = vpack.c.bf16 %v1712_v9, %v1712_v9 }
 0x128   :  { %2990 = vmatpush3.bf16.msra.mxu1 %v3180_v47 }
 0x129   :  { %2978 = vmatpush3.bf16.msra.mxu0 %v3179_v46  ;;  %2991 = vmatprep.subr.bf16.mxu1 %v3223_v0 }
 0x12a   :  { %2979 = vmatprep.subr.bf16.mxu0 %v3223_v0 }
 0x12c   :  { %2992 = vmatpush3.bf16.msra.mxu1 %v3182_v49 }
 0x12d   :  { %2980 = vmatpush3.bf16.msra.mxu0 %v3181_v48  ;;  %2993 = vmatprep.subr.bf16.mxu1 %v3223_v0 }
 0x12e   :  { %2981 = vmatprep.subr.bf16.mxu0 %v3223_v0 }
 0x130   :  { %2994 = vmatpush3.bf16.msra.mxu1 %v3184_v51 }
 0x131   :  { %2982 = vmatpush3.bf16.msra.mxu0 %v3183_v50  ;;  %3011 = vmatprep.subr.bf16.mxu1 %v3223_v0 }
 0x132   :  { %2999 = vmatprep.subr.bf16.mxu0 %v3223_v0 }
 0x133   :  { %2996 = vmatmul.mubr.msk.bf16.vlgmr.msra.gmra.mxu1 %vm39_vm2, %v1415_v57 }
 0x134   :  { %2984 = vmatmul.mubr.msk.bf16.vlgmr.msra.gmra.mxu0 %vm39_vm2, %v1433_v56  ;;  %3012 = vmatpush3.bf16.msra.mxu1 %v3186_v55 }
 0x135   :  { %3000 = vmatpush3.bf16.msra.mxu0 %v3185_v54  ;;  %3013 = vmatprep.subr.bf16.mxu1 %v3223_v0 }
 0x136   :  { %3001 = vmatprep.subr.bf16.mxu0 %v3223_v0  ;;  %3007 = vmatprep.mubr.msk.bf16.mxu0 %vm3224_vm0, %v3223_v0 }
 0x137   :  { %3019 = vmatprep.mubr.msk.bf16.mxu1 %vm3224_vm0, %v3223_v0 }
 0x138   :  { %3014 = vmatpush3.bf16.msra.mxu1 %v3188_v59 }
 0x139   :  { %3002 = vmatpush3.bf16.msra.mxu0 %v3187_v58  ;;  %3015 = vmatprep.subr.bf16.mxu1 %v3223_v0 }
 0x13a   :  { %3003 = vmatprep.subr.bf16.mxu0 %v3223_v0 }
 0x13c   :  { %3016 = vmatpush3.bf16.msra.mxu1 %v3190_v61 }
 0x13d   :  { %3004 = vmatpush3.bf16.msra.mxu0 %v3189_v60  ;;  %3017 = vmatprep.subr.bf16.mxu1 %v3223_v0 }
 0x13e   :  { %3005 = vmatprep.subr.bf16.mxu0 %v3223_v0 }
 0x140   :  { %3018 = vmatpush3.bf16.msra.mxu1 %v3192_v63 }
 0x141   :  { %3006 = vmatpush3.bf16.msra.mxu0 %v3191_v62  ;;  %3035 = vmatprep.subr.bf16.mxu1 %v3223_v0 }
 0x142   :  { %3023 = vmatprep.subr.bf16.mxu0 %v3223_v0 }
 0x143   :  { %3020 = vmatmul.mubr.msk.bf16.vlgmr.msra.gmra.mxu1 %vm39_vm2, %v1415_v57 }
 0x144   :  { %3008 = vmatmul.mubr.msk.bf16.vlgmr.msra.gmra.mxu0 %vm39_vm2, %v1433_v56  ;;  %3036 = vmatpush3.bf16.msra.mxu1 %v3194_v2 }
 0x145   :  { %3024 = vmatpush3.bf16.msra.mxu0 %v3193_v1  ;;  %3037 = vmatprep.subr.bf16.mxu1 %v3223_v0 }
 0x146   :  { %3025 = vmatprep.subr.bf16.mxu0 %v3223_v0  ;;  %3031 = vmatprep.mubr.msk.bf16.mxu0 %vm3224_vm0, %v3223_v0 }
 0x147   :  { %3043 = vmatprep.mubr.msk.bf16.mxu1 %vm3224_vm0, %v3223_v0 }
 0x148   :  { %3038 = vmatpush3.bf16.msra.mxu1 %v3196_v4 }
 0x149   :  { %3026 = vmatpush3.bf16.msra.mxu0 %v3195_v3  ;;  %3039 = vmatprep.subr.bf16.mxu1 %v3223_v0 }
 0x14a   :  { %3027 = vmatprep.subr.bf16.mxu0 %v3223_v0 }
 0x14c   :  { %3040 = vmatpush3.bf16.msra.mxu1 %v3198_v6 }
 0x14d   :  { %3028 = vmatpush3.bf16.msra.mxu0 %v3197_v5  ;;  %3041 = vmatprep.subr.bf16.mxu1 %v3223_v0 }
 0x14e   :  { %3029 = vmatprep.subr.bf16.mxu0 %v3223_v0 }
 0x150   :  { %3042 = vmatpush3.bf16.msra.mxu1 %v3200_v8 }
 0x151   :  { %3030 = vmatpush3.bf16.msra.mxu0 %v3199_v7  ;;  %3059 = vmatprep.subr.bf16.mxu1 %v3223_v0 }
 0x152   :  { %3047 = vmatprep.subr.bf16.mxu0 %v3223_v0 }
 0x153   :  { %3044 = vmatmul.mubr.msk.bf16.vlgmr.msra.gmra.mxu1 %vm39_vm2, %v1713_v10 }
 0x154   :  { %3032 = vmatmul.mubr.msk.bf16.vlgmr.msra.gmra.mxu0 %vm39_vm2, %v1713_v10  ;;  %3067 = vmatprep.mubr.msk.bf16.mxu1 %vm3224_vm0, %v3223_v0 }
 0x155   :  { %3055 = vmatprep.mubr.msk.bf16.mxu0 %vm3224_vm0, %v3223_v0  ;;  %3048 = vmatpush3.bf16.msra.mxu0 %v3201_v11 }
 0x156   :  { %3060 = vmatpush3.bf16.msra.mxu1 %v3202_v12  ;;  %3049 = vmatprep.subr.bf16.mxu0 %v3223_v0 }
 0x157   :  { %3061 = vmatprep.subr.bf16.mxu1 %v3223_v0 }
 0x159   :  { %3050 = vmatpush3.bf16.msra.mxu0 %v3203_v13 }
 0x15a   :  { %3062 = vmatpush3.bf16.msra.mxu1 %v3204_v14  ;;  %3051 = vmatprep.subr.bf16.mxu0 %v3223_v0 }
 0x15b   :  { %3063 = vmatprep.subr.bf16.mxu1 %v3223_v0 }
 0x15d   :  { %3052 = vmatpush3.bf16.msra.mxu0 %v3205_v15 }
 0x15e   :  { %3064 = vmatpush3.bf16.msra.mxu1 %v3206_v16  ;;  %3053 = vmatprep.subr.bf16.mxu0 %v3223_v0 }
 0x15f   :  { %3065 = vmatprep.subr.bf16.mxu1 %v3223_v0 }
 0x161   :  { %3054 = vmatpush3.bf16.msra.mxu0 %v3207_v17 }
 0x162   :  { %3066 = vmatpush3.bf16.msra.mxu1 %v3208_v18  ;;  %3071 = vmatprep.subr.bf16.mxu0 %v3223_v0 }
 0x163   :  { %3083 = vmatprep.subr.bf16.mxu1 %v3223_v0 }
 0x1c3   :  { %v1097_v20 = vpop.f32.mrf.mxu1 }
 0x1c4   :  { %v1030_v19 = vpop.f32.mrf.mxu0 }
 0x1c5   :  { %v2925_v22 = vpop.f32.mrf.mxu1  ;;  %v1098_v36 = vadd.f32 %v1097_v20, %v1030_v19 }
 0x1c6   :  { %v2913_v21 = vpop.f32.mrf.mxu0 }
 0x1c7   :  { %v1100_v25 = vpop.f32.mrf.mxu1 }
 0x1c8   :  { %v1033_v23 = vpop.f32.mrf.mxu0 }
 0x1c9   :  { %v2926_v27 = vpop.f32.mrf.mxu1  ;;  %v3209_v23 = vld [vmem:[%s3892_s5 + $0x58] sm:$0xff]  }
 0x1ca   :  { %v2914_v26 = vpop.f32.mrf.mxu0  ;;  %v3210_v27 = vld [vmem:[%s3892_s5 + $0x78] sm:$0xff]  }
 0x1d3   :  { %v1234_v29 = vpop.f32.mrf.mxu1 }
 0x1d4   :  { %v1170_v28 = vpop.f32.mrf.mxu0 }
 0x1d5   :  { %v2949_v31 = vpop.f32.mrf.mxu1  ;;  %v1235_v37 = vadd.f32 %v1234_v29, %v1170_v28 }
 0x1d6   :  { %v2937_v30 = vpop.f32.mrf.mxu0  ;;  %v3212_v31 = vld [vmem:[%s3892_s5 + $0x70] sm:$0xff]  }
 0x1d7   :  { %v1237_v33 = vpop.f32.mrf.mxu1  ;;  %v3211_v30 = vld [vmem:[%s3892_s5 + $0x50] sm:$0xff]  }
 0x1d8   :  { %v1173_v32 = vpop.f32.mrf.mxu0  ;;  %v3214_v33 = vld [vmem:[%s3892_s5 + $0x68] sm:$0xff]  }
 0x1d9   :  { %v2950_v35 = vpop.f32.mrf.mxu1  ;;  %v3213_v32 = vld [vmem:[%s3892_s5 + $0x48] sm:$0xff]  }
 0x1da   :  { %v2938_v34 = vpop.f32.mrf.mxu0  ;;  %v3216_v35 = vld [vmem:[%s3892_s5 + $0x60] sm:$0xff]  }
 0x1db   :  { %v3215_v34 = vld [vmem:[%s3892_s5 + $0x40] sm:$0xff]  }
 0x1e3   :  { %v1386_v38 = vpop.f32.mrf.mxu1 }
 0x1e4   :  { %v1312_v24 = vpop.f32.mrf.mxu0  ;;  %v1392_v40 = vadd.f32 %v1386_v38, %v1235_v37 }
 0x1e5   :  { %v1318_v39 = vadd.f32 %v1312_v24, %v1098_v36  ;;  %v2973_v43 = vpop.f32.mrf.mxu1 }
 0x1e6   :  { %v2961_v42 = vpop.f32.mrf.mxu0  ;;  %v3221_v43 = vld [vmem:[%s3895_s9 + $0x8] sm:$0xff]  }
 0x1e7   :  { %v1393_v44 = vmax.f32 %v1318_v39, %v1392_v40  ;;  %v1389_v46 = vpop.f32.mrf.mxu1  ;;  %v3217_v39 = vld [vmem:[%s3894_s7 + $0x18] sm:$0xff]   ;;  %v3218_v40 = vld [vmem:[%s3894_s7 + $0x10] sm:$0xff]   ;;  %v3220_v42 = vld [vmem:[%s3894_s7] sm:$0xff]  }
 0x1e8   :  { %v1315_v45 = vpop.f32.mrf.mxu0 }
 0x1e9   :  { %v1401_v47 = vadd.f32 %v2544_v41, %v1393_v44  ;;  %v2974_v49 = vpop.f32.mrf.mxu1 }
 0x1ea   :  { %v2962_v48 = vpop.f32.mrf.mxu0 }
 0x1eb   :  { %v1402_v50 = vmax.f32 %v1401_v47, 0.0 }
 0x1ed   :  { %v1404_v51 = vrot.slane %v1402_v50, 1 }
 0x1ef   :  { %v1406_v52 = vmax.f32 %v1402_v50, %v1404_v51 }
 0x1f1   :  { %1407 = vst.msk [vmem:[#allocation3] sm:$0x1] %vm480_vm4, %v1406_v52 }
 0x1f2   :  { %1409 = vst.msk [vmem:[#allocation3] sm:$0x4] %vm482_vm5, %v1406_v52 }
 0x1f3   :  { %1411 = vst.msk [vmem:[#allocation3] sm:$0x10] %vm484_vm6, %v1406_v52  ;;  %v1570_v54 = vpop.f32.mrf.mxu1 }
 0x1f4   :  { %1413 = vst.msk [vmem:[#allocation3] sm:$0x40] %vm486_vm7, %v1406_v52  ;;  %v1503_v53 = vpop.f32.mrf.mxu0 }
 0x1f5   :  { %v2997_v56 = vpop.f32.mrf.mxu1  ;;  %v1571_v6 = vadd.f32 %v1570_v54, %v1503_v53 }
 0x1f6   :  { %v2985_v55 = vpop.f32.mrf.mxu0  ;;  %v2636_v56 = vld [vmem:[%s3896_s6] ss:$0 sm:$0xff] }
 0x1f7   :  { %v1573_v58 = vpop.f32.mrf.mxu1 }
 0x1f8   :  { %v1506_v57 = vpop.f32.mrf.mxu0 }
 0x1f9   :  { %v2998_v60 = vpop.f32.mrf.mxu1 }
 0x1fa   :  { %v2986_v59 = vpop.f32.mrf.mxu0 }
 0x203   :  { %v1706_v62 = vpop.f32.mrf.mxu1 }
 0x204   :  { %v1642_v61 = vpop.f32.mrf.mxu0 }
 0x205   :  { %v3021_v1 = vpop.f32.mrf.mxu1  ;;  %v1707_v7 = vadd.f32 %v1706_v62, %v1642_v61 }
 0x206   :  { %v3009_v63 = vpop.f32.mrf.mxu0 }
 0x207   :  { %v1709_v3 = vpop.f32.mrf.mxu1 }
 0x208   :  { %v1645_v2 = vpop.f32.mrf.mxu0  ;;  %v3222_v3 = vld [vmem:[%s3895_s9] sm:$0xff]  }
 0x209   :  { %v3022_v5 = vpop.f32.mrf.mxu1 }
 0x20a   :  { %v3010_v4 = vpop.f32.mrf.mxu0 }
 0x20b   :  { %v2637_v4 = vld [vmem:[%s3897_s8] ss:$0 sm:$0xff] }
 0x213   :  { %v1856_v9 = vpop.f32.mrf.mxu1 }
 0x214   :  { %v1783_v8 = vpop.f32.mrf.mxu0  ;;  %v1862_v11 = vadd.f32 %v1856_v9, %v1707_v7 }
 0x215   :  { %v1789_v10 = vadd.f32 %v1783_v8, %v1571_v6  ;;  %v3045_v13 = vpop.f32.mrf.mxu1 }
 0x216   :  { %v3033_v12 = vpop.f32.mrf.mxu0 }
 0x217   :  { %v1863_v14 = vmax.f32 %v1789_v10, %v1862_v11  ;;  %v1859_v16 = vpop.f32.mrf.mxu1  ;;  %v2643_v12 = vld [vmem:[%s3898_s10] ss:$0 sm:$0xff] }
 0x218   :  { %v1786_v15 = vpop.f32.mrf.mxu0 }
 0x219   :  { %v1871_v17 = vadd.f32 %v2544_v41, %v1863_v14  ;;  %v3046_v19 = vpop.f32.mrf.mxu1  ;;  %v3219_v41 = vld [vmem:[%s3894_s7 + $0x8] sm:$0xff]  }
 0x21a   :  { %v3034_v18 = vpop.f32.mrf.mxu0 }
 0x21b   :  { %v1872_v20 = vmax.f32 %v1871_v17, 0.0 }
 0x21d   :  { %v1874_v21 = vrot.slane %v1872_v20, 1 }
 0x21f   :  { %v1876_v22 = vmax.f32 %v1872_v20, %v1874_v21 }
 0x221   :  { %1877 = vst.msk [vmem:[#allocation3 + $0x1] sm:$0x1] %vm480_vm4, %v1876_v22 }
 0x222   :  { %1878 = vst.msk [vmem:[#allocation3 + $0x1] sm:$0x4] %vm482_vm5, %v1876_v22 }
 0x223   :  { %1879 = vst.msk [vmem:[#allocation3 + $0x1] sm:$0x10] %vm484_vm6, %v1876_v22 }
 0x224   :  { %1880 = vst.msk [vmem:[#allocation3 + $0x1] sm:$0x40] %vm486_vm7, %v1876_v22 }
 0x228   :  { %v1881_v26 = vld [vmem:[#allocation3] sm:$0x3] }
 0x229   :  { %v1891_v25 = vld [vmem:[#allocation3 + $0x2] sm:$0x3]  ;;  %v1882_v29 = vpack.c.bf16 %v1881_v26, %v1881_v26 }
 0x22a   :  { %v1892_v28 = vpack.c.bf16 %v1891_v25, %v1891_v25  ;;  %v2035_v36 = vld [vmem:[#allocation3 + $0x4] sm:$0x3] }
 0x22b   :  { %3068 = vmatmul.mubr.msk.bf16.vlgmr.msra.gmra.mxu1 %vm39_vm2, %v1882_v29  ;;  %v2113_v37 = vld [vmem:[#allocation3 + $0x6] sm:$0x3]  ;;  %v2036_v24 = vpack.c.bf16 %v2035_v36, %v2035_v36 }
 0x22c   :  { %3056 = vmatmul.mubr.msk.bf16.vlgmr.msra.gmra.mxu0 %vm39_vm2, %v1892_v28  ;;  %3084 = vmatpush3.bf16.msra.mxu1 %v3210_v27  ;;  %v2114_v38 = vpack.c.bf16 %v2113_v37, %v2113_v37 }
 0x22d   :  { %3072 = vmatpush3.bf16.msra.mxu0 %v3209_v23  ;;  %3085 = vmatprep.subr.bf16.mxu1 %v3223_v0 }
 0x22e   :  { %3073 = vmatprep.subr.bf16.mxu0 %v3223_v0  ;;  %3079 = vmatprep.mubr.msk.bf16.mxu0 %vm3224_vm0, %v3223_v0 }
 0x22f   :  { %3091 = vmatprep.mubr.msk.bf16.mxu1 %vm3224_vm0, %v3223_v0 }
 0x230   :  { %3086 = vmatpush3.bf16.msra.mxu1 %v3212_v31 }
 0x231   :  { %3074 = vmatpush3.bf16.msra.mxu0 %v3211_v30  ;;  %3087 = vmatprep.subr.bf16.mxu1 %v3223_v0 }
 0x232   :  { %3075 = vmatprep.subr.bf16.mxu0 %v3223_v0 }
 0x234   :  { %3088 = vmatpush3.bf16.msra.mxu1 %v3214_v33 }
 0x235   :  { %3076 = vmatpush3.bf16.msra.mxu0 %v3213_v32  ;;  %3089 = vmatprep.subr.bf16.mxu1 %v3223_v0 }
 0x236   :  { %3077 = vmatprep.subr.bf16.mxu0 %v3223_v0 }
 0x238   :  { %3090 = vmatpush3.bf16.msra.mxu1 %v3216_v35 }
 0x239   :  { %3078 = vmatpush3.bf16.msra.mxu0 %v3215_v34  ;;  %3107 = vmatprep.subr.bf16.mxu1 %v3223_v0 }
 0x23a   :  { %3095 = vmatprep.subr.bf16.mxu0 %v3223_v0 }
 0x23b   :  { %3092 = vmatmul.mubr.msk.bf16.vlgmr.msra.gmra.mxu1 %vm39_vm2, %v2114_v38 }
 0x23c   :  { %3080 = vmatmul.mubr.msk.bf16.vlgmr.msra.gmra.mxu0 %vm39_vm2, %v2036_v24  ;;  %3111 = vmatprep.mubr.msk.bf16.mxu1 %vm3224_vm0, %v3223_v0 }
 0x23d   :  { %3103 = vmatprep.mubr.msk.bf16.mxu0 %vm3224_vm0, %v3223_v0  ;;  %3096 = vmatpush3.bf16.msra.mxu0 %v3217_v39 }
 0x23e   :  { %3097 = vmatprep.subr.bf16.mxu0 %v3223_v0  ;;  %3108 = vmatpush3.bf16.msra.mxu1 %v3221_v43 }
 0x23f   :  { %3109 = vmatprep.subr.bf16.mxu1 %v3223_v0 }
 0x241   :  { %3098 = vmatpush3.bf16.msra.mxu0 %v3218_v40 }
 0x242   :  { %3099 = vmatprep.subr.bf16.mxu0 %v3223_v0  ;;  %3110 = vmatpush3.bf16.msra.mxu1 %v3222_v3 }
 0x245   :  { %3100 = vmatpush3.bf16.msra.mxu0 %v3219_v41 }
 0x246   :  { %3101 = vmatprep.subr.bf16.mxu0 %v3223_v0 }
 0x249   :  { %3102 = vmatpush3.bf16.msra.mxu0 %v3220_v42 }
 0x2eb   :  { %v2029_v45 = vpop.f32.mrf.mxu1 }
 0x2ec   :  { %v1962_v44 = vpop.f32.mrf.mxu0 }
 0x2ed   :  { %v3069_v47 = vpop.f32.mrf.mxu1  ;;  %v2030_v52 = vadd.f32 %v2029_v45, %v1962_v44 }
 0x2ee   :  { %v3057_v46 = vpop.f32.mrf.mxu0 }
 0x2ef   :  { %v2032_v49 = vpop.f32.mrf.mxu1 }
 0x2f0   :  { %v1965_v48 = vpop.f32.mrf.mxu0 }
 0x2f1   :  { %v3070_v51 = vpop.f32.mrf.mxu1 }
 0x2f2   :  { %v3058_v50 = vpop.f32.mrf.mxu0 }
 0x2fb   :  { %v2184_v54 = vpop.f32.mrf.mxu1 }
 0x2fc   :  { %v2106_v53 = vpop.f32.mrf.mxu0 }
 0x2fd   :  { %v2112_v55 = vadd.f32 %v2106_v53, %v2030_v52  ;;  %v3093_v58 = vpop.f32.mrf.mxu1 }
 0x2fe   :  { %v3081_v57 = vpop.f32.mrf.mxu0 }
 0x2ff   :  { %v2190_v59 = vadd.f32 %v2184_v54, %v2112_v55  ;;  %v2187_v60 = vpop.f32.mrf.mxu1 }
 0x300   :  { %v2109_v0 = vpop.f32.mrf.mxu0 }
 0x301   :  { %v2198_v61 = vadd.f32 %v2636_v56, %v2190_v59  ;;  %v3094_v63 = vpop.f32.mrf.mxu1 }
 0x302   :  { %v3082_v62 = vpop.f32.mrf.mxu0 }
 0x303   :  { %v2199_v1 = vmax.f32 %v2198_v61, 0.0 }
 0x305   :  { %v2200_v2 = vpack.c.bf16 %v2199_v1, %v2199_v1 }
 0x307   :  { %3104 = vmatmul.mubr.msk.bf16.vlgmr.msra.gmra.mxu0 %vm39_vm2, %v2200_v2 }
 0x3c7   :  { %v2277_v5 = vpop.f32.mrf.mxu0 }
 0x3c8   :  { %v2278_v6 = vadd.f32 %v2637_v4, %v2277_v5 }
 0x3c9   :  { %v3105_v7 = vpop.f32.mrf.mxu0 }
 0x3ca   :  { %v2283_v8 = vmax.f32 %v2278_v6, 0.0 }
 0x3cb   :  { %v2280_v9 = vpop.f32.mrf.mxu0 }
 0x3cc   :  { %v2284_v10 = vpack.c.bf16 %v2283_v8, %v2283_v8 }
 0x3cd   :  { %v3106_v11 = vpop.f32.mrf.mxu0 }
 0x3ce   :  { %3112 = vmatmul.mubr.msk.bf16.vlgmr.msra.gmra.mxu1 %vm2308_vm8, %v2284_v10 }
 0x48e   :  { %v2346_v13 = vpop.f32.mrf.mxu1 }
 0x48f   :  { %v2347_v14 = vadd.f32 %v2643_v12, %v2346_v13 }
 0x490   :  { %v3113_v15 = vpop.f32.mrf.mxu1 }
 0x491   :  { %2353 = vst.msk [vmem:[%s3899_s11] sm:$0x3] %vm2352_vm9, %v2347_v14 }
 0x492   :  { %v2349_v16 = vpop.f32.mrf.mxu1 }
 0x494   :  { %v3114_v17 = vpop.f32.mrf.mxu1 }

</bundles_post_ra>
